<compile_context>
chip_gen: v6e
topology: v6e:2x2x1
jax: 0.10.0
libtpu: 0.0.40
codegen_flags: <defaults>
</compile_context>

<pallas_src>
import numpy as np
import jax
import jax.numpy as jnp
from jax.experimental import pallas as pl
from jax.experimental.pallas import tpu as pltpu

# ---- small hyperparameters consistent with the module ----
BATCH = 2
MAX_NUM_WORDS = 16      # hps.max_num_words  (seq_len)
WORD_EMB_DIM = 32       # hps.word_emb_dim
VOCAB = 50
OUT_CHANNELS = 50
KERNEL_SIZES = tuple(range(2, 8))       # 2..7 (min_kernel_size..max_kernel_size)
NUM_KS = len(KERNEL_SIZES)
KMAX = KERNEL_SIZES[-1]                 # 7
OUT_DIM = OUT_CHANNELS * NUM_KS         # 300
OUT_PAD = 384                           # 3 * 128 lanes (zero-padded columns)


def get_sinusoid_encoding_table(n_position, d_hid, padding_idx=None):
    position = np.arange(n_position)[:, None].astype(np.float64)
    hid = np.arange(d_hid)[None, :]
    angle = position / np.power(10000.0, 2.0 * (hid // 2) / d_hid)
    table = np.zeros((n_position, d_hid), dtype=np.float64)
    table[:, 0::2] = np.sin(angle[:, 0::2])
    table[:, 1::2] = np.cos(angle[:, 1::2])
    if padding_idx is not None:
        table[padding_idx] = 0.0
    return jnp.asarray(table, dtype=jnp.float32)


def sent_encoder_kernel(x_ref, w_ref, b_ref, mask_ref, out_ref):
    """Whole batch in one grid step; all compute on 2-D tiles.

    x_ref:    (B, L_pad, E)   conv input, zero-padded along time to >= L + KMAX - 1
    w_ref:    (KMAX*E, OUT_PAD)  fused conv weights (zero rows past each block's k*E,
                                  zero lanes past OUT_DIM)
    b_ref:    (1, OUT_PAD)       fused biases (zero-padded lanes)
    mask_ref: (L, OUT_PAD)       1.0 where the time position is valid for that column block
    out_ref:  (B, OUT_PAD)
    """
    B = out_ref.shape[0]
    E = x_ref.shape[2]
    L = mask_ref.shape[0]

    w_all = w_ref[...]                                         # (KMAX*E, OUT_PAD), loaded once
    bias = b_ref[...]                                          # (1, OUT_PAD)
    mask = mask_ref[...]                                       # (L, OUT_PAD)

    rows = []
    for b in range(B):                                         # B = 2, unrolled
        x_b = x_ref[b]                                         # (L_pad, E)
        y = jnp.zeros((L, OUT_PAD), dtype=jnp.float32)
        # Shifted-accumulate convolution: no im2col, sublane-aligned weight slices.
        for dk in range(KMAX):
            y = y + jnp.dot(x_b[dk:dk + L, :],                 # (L, E)
                            w_all[dk * E:(dk + 1) * E, :],     # (E, OUT_PAD)
                            preferred_element_type=jnp.float32)
        y = jnp.maximum(y + bias, 0.0) * mask                  # bias + ReLU, zero invalid t
        rows.append(jnp.max(y, axis=0, keepdims=True))         # max over time -> (1, OUT_PAD)
    out_ref[...] = jnp.concatenate(rows, axis=0)               # one lane-dense (B, OUT_PAD) store


def sent_encoder_forward(input_ids, emb_table, pos_table, conv_weights, conv_biases):
    """input_ids: [B, L] int32  ->  [B, NUM_KS*OUT_CHANNELS] float32."""
    B, L = input_ids.shape
    E = emb_table.shape[1]

    # ---- glue in plain JAX: embedding gathers + positional masking (fused by XLA) ----
    # TODO(synk): the id-dependent gathers could be pulled in-kernel via
    # PrefetchScalarGridSpec (tables are only ~8 KB); negligible at these shapes.
    word_embed = emb_table[input_ids]                                   # [B, L, E]
    seq_lens = jnp.sum((input_ids != 0).astype(jnp.int32), axis=-1)     # [B]
    positions = jnp.arange(1, L + 1, dtype=jnp.int32)[None, :]          # [1, L]
    masked_positions = jnp.where(positions > seq_lens[:, None], 0, positions)
    pos_embed = pos_table[masked_positions]                             # [B, L, E]
    x = (word_embed + pos_embed).astype(jnp.float32)                    # [B, L, E]

    # Zero-pad time so every shifted window stays in-bounds (round up to sublane multiple).
    L_pad = ((L + KMAX - 1 + 7) // 8) * 8
    x_pad = jnp.pad(x, ((0, 0), (0, L_pad - L), (0, 0)))                # [B, L_pad, E]

    # ---- fuse the six conv weights / biases into single lane-padded operands ----
    # Conv1d weight [O, E, k] -> [k*E, O] with window[t, dk*E + c] = x[t+dk, c];
    # pad each block to KMAX*E rows and stack column blocks, then pad lanes to OUT_PAD.
    blocks = []
    for k, W in zip(KERNEL_SIZES, conv_weights):
        w_mat = jnp.transpose(W, (2, 1, 0)).reshape(k * E, OUT_CHANNELS)
        blocks.append(jnp.pad(w_mat, ((0, (KMAX - k) * E), (0, 0))))
    w_fused = jnp.concatenate(blocks, axis=1)                           # [KMAX*E, 300]
    w_fused = jnp.pad(w_fused, ((0, 0), (0, OUT_PAD - OUT_DIM)))        # [KMAX*E, 384]

    b_fused = jnp.concatenate(conv_biases).reshape(1, OUT_DIM)
    b_fused = jnp.pad(b_fused, ((0, 0), (0, OUT_PAD - OUT_DIM)))        # [1, 384]

    # Validity mask: column block ki (kernel size k = ki + 2) is valid for t <= L - k.
    t_idx = jnp.arange(L)[:, None]                                      # [L, 1]
    ki_idx = jnp.repeat(jnp.arange(NUM_KS), OUT_CHANNELS)[None, :]      # [1, 300]
    valid_mask = (t_idx <= (L - 2 - ki_idx)).astype(jnp.float32)        # [L, 300]
    valid_mask = jnp.pad(valid_mask, ((0, 0), (0, OUT_PAD - OUT_DIM)))  # [L, 384]

    in_specs = [
        pl.BlockSpec((B, L_pad, E), lambda i: (0, 0, 0)),       # conv input (whole batch)
        pl.BlockSpec((KMAX * E, OUT_PAD), lambda i: (0, 0)),    # fused weights
        pl.BlockSpec((1, OUT_PAD), lambda i: (0, 0)),           # fused bias
        pl.BlockSpec((L, OUT_PAD), lambda i: (0, 0)),           # validity mask
    ]
    out_spec = pl.BlockSpec((B, OUT_PAD), lambda i: (0, 0))

    out_padded = pl.pallas_call(
        sent_encoder_kernel,
        out_shape=jax.ShapeDtypeStruct((B, OUT_PAD), jnp.float32),
        grid=(1,),
        in_specs=in_specs,
        out_specs=out_spec,
        compiler_params=pltpu.CompilerParams(dimension_semantics=("arbitrary",)),
    )(x_pad, w_fused, b_fused, valid_mask)

    return out_padded[:, :OUT_DIM]                                      # [B, 300]


def sent_encoder_reference(input_ids, emb_table, pos_table, conv_weights, conv_biases):
    """Pure-JAX reference mirroring the PyTorch forward (NCW convs)."""
    B, L = input_ids.shape
    word_embed = emb_table[input_ids]
    seq_lens = jnp.sum((input_ids != 0).astype(jnp.int32), axis=-1)
    positions = jnp.arange(1, L + 1, dtype=jnp.int32)[None, :]
    masked_positions = jnp.where(positions > seq_lens[:, None], 0, positions)
    pos_embed = pos_table[masked_positions]
    conv_input = jnp.transpose(word_embed + pos_embed, (0, 2, 1))       # [B, E, L]
    outs = []
    for k, W, b in zip(KERNEL_SIZES, conv_weights, conv_biases):
        y = jax.lax.conv_general_dilated(conv_input, W, window_strides=(1,),
                                         padding='VALID',
                                         dimension_numbers=('NCW', 'OIW', 'NCW'))
        y = jax.nn.relu(y + b[None, :, None])
        outs.append(jnp.max(y, axis=2))
    return jnp.concatenate(outs, axis=1)


if __name__ == "__main__":
    key = jax.random.PRNGKey(0)
    keys = jax.random.split(key, 2 + 2 * NUM_KS)
    k_ids, k_emb = keys[0], keys[1]
    w_keys = keys[2:2 + NUM_KS]
    b_keys = keys[2 + NUM_KS:2 + 2 * NUM_KS]

    # token ids with trailing padding (0 = pad)
    ids = jax.random.randint(k_ids, (BATCH, MAX_NUM_WORDS), 1, VOCAB, dtype=jnp.int32)
    lens = jnp.array([12, 7], dtype=jnp.int32)
    ids = jnp.where(jnp.arange(MAX_NUM_WORDS)[None, :] < lens[:, None], ids, 0)

    # deterministic synthetic parameters (no checkpoint load)
    emb_table = jax.random.normal(k_emb, (VOCAB, WORD_EMB_DIM), dtype=jnp.float32)
    pos_table = get_sinusoid_encoding_table(MAX_NUM_WORDS + 1, WORD_EMB_DIM, padding_idx=0)

    conv_weights, conv_biases = [], []
    for i, k in enumerate(KERNEL_SIZES):
        fan_in = WORD_EMB_DIM * k
        fan_out = OUT_CHANNELS * k
        # xavier_normal_ with gain=sqrt(6)
        std = float(np.sqrt(6.0) * np.sqrt(2.0 / (fan_in + fan_out)))
        W = jax.random.normal(w_keys[i], (OUT_CHANNELS, WORD_EMB_DIM, k),
                              dtype=jnp.float32) * std
        bound = float(1.0 / np.sqrt(fan_in))
        bias = jax.random.uniform(b_keys[i], (OUT_CHANNELS,), dtype=jnp.float32,
                                  minval=-bound, maxval=bound)
        conv_weights.append(W)
        conv_biases.append(bias)

    out = sent_encoder_forward(ids, emb_table, pos_table, conv_weights, conv_biases)
    out = jax.block_until_ready(out)

    ref = sent_encoder_reference(ids, emb_table, pos_table, conv_weights, conv_biases)
    np.testing.assert_allclose(np.asarray(out), np.asarray(ref), rtol=1e-5, atol=1e-5)

    print("KERNEL_OK")
</pallas_src>

<mosaic_0001>
module attributes {stable_mosaic.version = 11 : i64} {
  func.func @sent_encoder_kernel(%arg0: i32, %arg1: memref<2x24x32xf32, #tpu.memory_space<vmem>>, %arg2: memref<224x384xf32, #tpu.memory_space<vmem>>, %arg3: memref<1x384xf32, #tpu.memory_space<vmem>>, %arg4: memref<16x384xf32, #tpu.memory_space<vmem>>, %arg5: memref<2x384xf32, #tpu.memory_space<vmem>>) attributes {dimension_semantics = [#tpu.dimension_semantics<arbitrary>], iteration_bounds = array<i64: 1>, scalar_prefetch = 0 : i64, scratch_operands = 0 : i64, tpu.core_type = #tpu.core_type<tc>, window_params = [{pipeline_mode = #tpu.pipeline_mode<synchronous>, transform_indices = @transform_0, window_bounds = array<i64: 2, 24, 32>}, {pipeline_mode = #tpu.pipeline_mode<synchronous>, transform_indices = @transform_1, window_bounds = array<i64: 224, 384>}, {pipeline_mode = #tpu.pipeline_mode<synchronous>, transform_indices = @transform_2, window_bounds = array<i64: 1, 384>}, {pipeline_mode = #tpu.pipeline_mode<synchronous>, transform_indices = @transform_3, window_bounds = array<i64: 16, 384>}, {pipeline_mode = #tpu.pipeline_mode<synchronous>, transform_indices = @transform_4, window_bounds = array<i64: 2, 384>}]} {
    %c0 = arith.constant 0 : index
    %c0_0 = arith.constant 0 : index
    %0 = vector.load %arg2[%c0, %c0_0] : memref<224x384xf32, #tpu.memory_space<vmem>>, vector<224x384xf32>
    %c0_1 = arith.constant 0 : index
    %c0_2 = arith.constant 0 : index
    %1 = vector.load %arg3[%c0_1, %c0_2] : memref<1x384xf32, #tpu.memory_space<vmem>>, vector<1x384xf32>
    %c0_3 = arith.constant 0 : index
    %c0_4 = arith.constant 0 : index
    %2 = vector.load %arg4[%c0_3, %c0_4] : memref<16x384xf32, #tpu.memory_space<vmem>>, vector<16x384xf32>
    %c0_5 = arith.constant 0 : index
    %c0_6 = arith.constant 0 : index
    %c0_7 = arith.constant 0 : index
    %3 = vector.load %arg1[%c0_5, %c0_6, %c0_7] : memref<2x24x32xf32, #tpu.memory_space<vmem>>, vector<1x24x32xf32>
    %4 = vector.shape_cast %3 : vector<1x24x32xf32> to vector<24x32xf32>
    %cst = arith.constant 0.000000e+00 : f32
    %5 = vector.broadcast %cst : f32 to vector<16x384xf32>
    %6 = vector.extract_strided_slice %4 {offsets = [0, 0], sizes = [16, 32], strides = [1, 1]} : vector<24x32xf32> to vector<16x32xf32>
    %7 = vector.extract_strided_slice %0 {offsets = [0, 0], sizes = [32, 384], strides = [1, 1]} : vector<224x384xf32> to vector<32x384xf32>
    %cst_8 = arith.constant dense<0.000000e+00> : vector<16x384xf32>
    %8 = tpu.matmul %6, %7, %cst_8 {dimension_numbers = #tpu.dot_dimension_numbers<[1], [0], [0], [1], [0, 0, 1, 1], [], []>} : vector<16x32xf32>, vector<32x384xf32>, vector<16x384xf32> -> vector<16x384xf32>
    %9 = arith.addf %5, %8 : vector<16x384xf32>
    %10 = vector.extract_strided_slice %4 {offsets = [1, 0], sizes = [16, 32], strides = [1, 1]} : vector<24x32xf32> to vector<16x32xf32>
    %11 = vector.extract_strided_slice %0 {offsets = [32, 0], sizes = [32, 384], strides = [1, 1]} : vector<224x384xf32> to vector<32x384xf32>
    %cst_9 = arith.constant dense<0.000000e+00> : vector<16x384xf32>
    %12 = tpu.matmul %10, %11, %cst_9 {dimension_numbers = #tpu.dot_dimension_numbers<[1], [0], [0], [1], [0, 0, 1, 1], [], []>} : vector<16x32xf32>, vector<32x384xf32>, vector<16x384xf32> -> vector<16x384xf32>
    %13 = arith.addf %9, %12 : vector<16x384xf32>
    %14 = vector.extract_strided_slice %4 {offsets = [2, 0], sizes = [16, 32], strides = [1, 1]} : vector<24x32xf32> to vector<16x32xf32>
    %15 = vector.extract_strided_slice %0 {offsets = [64, 0], sizes = [32, 384], strides = [1, 1]} : vector<224x384xf32> to vector<32x384xf32>
    %cst_10 = arith.constant dense<0.000000e+00> : vector<16x384xf32>
    %16 = tpu.matmul %14, %15, %cst_10 {dimension_numbers = #tpu.dot_dimension_numbers<[1], [0], [0], [1], [0, 0, 1, 1], [], []>} : vector<16x32xf32>, vector<32x384xf32>, vector<16x384xf32> -> vector<16x384xf32>
    %17 = arith.addf %13, %16 : vector<16x384xf32>
    %18 = vector.extract_strided_slice %4 {offsets = [3, 0], sizes = [16, 32], strides = [1, 1]} : vector<24x32xf32> to vector<16x32xf32>
    %19 = vector.extract_strided_slice %0 {offsets = [96, 0], sizes = [32, 384], strides = [1, 1]} : vector<224x384xf32> to vector<32x384xf32>
    %cst_11 = arith.constant dense<0.000000e+00> : vector<16x384xf32>
    %20 = tpu.matmul %18, %19, %cst_11 {dimension_numbers = #tpu.dot_dimension_numbers<[1], [0], [0], [1], [0, 0, 1, 1], [], []>} : vector<16x32xf32>, vector<32x384xf32>, vector<16x384xf32> -> vector<16x384xf32>
    %21 = arith.addf %17, %20 : vector<16x384xf32>
    %22 = vector.extract_strided_slice %4 {offsets = [4, 0], sizes = [16, 32], strides = [1, 1]} : vector<24x32xf32> to vector<16x32xf32>
    %23 = vector.extract_strided_slice %0 {offsets = [128, 0], sizes = [32, 384], strides = [1, 1]} : vector<224x384xf32> to vector<32x384xf32>
    %cst_12 = arith.constant dense<0.000000e+00> : vector<16x384xf32>
    %24 = tpu.matmul %22, %23, %cst_12 {dimension_numbers = #tpu.dot_dimension_numbers<[1], [0], [0], [1], [0, 0, 1, 1], [], []>} : vector<16x32xf32>, vector<32x384xf32>, vector<16x384xf32> -> vector<16x384xf32>
    %25 = arith.addf %21, %24 : vector<16x384xf32>
    %26 = vector.extract_strided_slice %4 {offsets = [5, 0], sizes = [16, 32], strides = [1, 1]} : vector<24x32xf32> to vector<16x32xf32>
    %27 = vector.extract_strided_slice %0 {offsets = [160, 0], sizes = [32, 384], strides = [1, 1]} : vector<224x384xf32> to vector<32x384xf32>
    %cst_13 = arith.constant dense<0.000000e+00> : vector<16x384xf32>
    %28 = tpu.matmul %26, %27, %cst_13 {dimension_numbers = #tpu.dot_dimension_numbers<[1], [0], [0], [1], [0, 0, 1, 1], [], []>} : vector<16x32xf32>, vector<32x384xf32>, vector<16x384xf32> -> vector<16x384xf32>
    %29 = arith.addf %25, %28 : vector<16x384xf32>
    %30 = vector.extract_strided_slice %4 {offsets = [6, 0], sizes = [16, 32], strides = [1, 1]} : vector<24x32xf32> to vector<16x32xf32>
    %31 = vector.extract_strided_slice %0 {offsets = [192, 0], sizes = [32, 384], strides = [1, 1]} : vector<224x384xf32> to vector<32x384xf32>
    %cst_14 = arith.constant dense<0.000000e+00> : vector<16x384xf32>
    %32 = tpu.matmul %30, %31, %cst_14 {dimension_numbers = #tpu.dot_dimension_numbers<[1], [0], [0], [1], [0, 0, 1, 1], [], []>} : vector<16x32xf32>, vector<32x384xf32>, vector<16x384xf32> -> vector<16x384xf32>
    %33 = arith.addf %29, %32 : vector<16x384xf32>
    %34 = vector.broadcast %1 : vector<1x384xf32> to vector<16x384xf32>
    %35 = arith.addf %33, %34 : vector<16x384xf32>
    %cst_15 = arith.constant 0.000000e+00 : f32
    %36 = vector.broadcast %cst_15 : f32 to vector<16x384xf32>
    %37 = arith.maximumf %35, %36 : vector<16x384xf32>
    %38 = arith.mulf %37, %2 : vector<16x384xf32>
    %cst_16 = arith.constant dense<0xFF800000> : vector<384xf32>
    %39 = vector.multi_reduction <maximumf>, %38, %cst_16 [0] : vector<16x384xf32> to vector<384xf32>
    %40 = vector.shape_cast %39 : vector<384xf32> to vector<1x384xf32>
    %c1 = arith.constant 1 : index
    %c0_17 = arith.constant 0 : index
    %c0_18 = arith.constant 0 : index
    %41 = vector.load %arg1[%c1, %c0_17, %c0_18] : memref<2x24x32xf32, #tpu.memory_space<vmem>>, vector<1x24x32xf32>
    %42 = vector.shape_cast %41 : vector<1x24x32xf32> to vector<24x32xf32>
    %cst_19 = arith.constant 0.000000e+00 : f32
    %43 = vector.broadcast %cst_19 : f32 to vector<16x384xf32>
    %44 = vector.extract_strided_slice %42 {offsets = [0, 0], sizes = [16, 32], strides = [1, 1]} : vector<24x32xf32> to vector<16x32xf32>
    %45 = vector.extract_strided_slice %0 {offsets = [0, 0], sizes = [32, 384], strides = [1, 1]} : vector<224x384xf32> to vector<32x384xf32>
    %cst_20 = arith.constant dense<0.000000e+00> : vector<16x384xf32>
    %46 = tpu.matmul %44, %45, %cst_20 {dimension_numbers = #tpu.dot_dimension_numbers<[1], [0], [0], [1], [0, 0, 1, 1], [], []>} : vector<16x32xf32>, vector<32x384xf32>, vector<16x384xf32> -> vector<16x384xf32>
    %47 = arith.addf %43, %46 : vector<16x384xf32>
    %48 = vector.extract_strided_slice %42 {offsets = [1, 0], sizes = [16, 32], strides = [1, 1]} : vector<24x32xf32> to vector<16x32xf32>
    %49 = vector.extract_strided_slice %0 {offsets = [32, 0], sizes = [32, 384], strides = [1, 1]} : vector<224x384xf32> to vector<32x384xf32>
    %cst_21 = arith.constant dense<0.000000e+00> : vector<16x384xf32>
    %50 = tpu.matmul %48, %49, %cst_21 {dimension_numbers = #tpu.dot_dimension_numbers<[1], [0], [0], [1], [0, 0, 1, 1], [], []>} : vector<16x32xf32>, vector<32x384xf32>, vector<16x384xf32> -> vector<16x384xf32>
    %51 = arith.addf %47, %50 : vector<16x384xf32>
    %52 = vector.extract_strided_slice %42 {offsets = [2, 0], sizes = [16, 32], strides = [1, 1]} : vector<24x32xf32> to vector<16x32xf32>
    %53 = vector.extract_strided_slice %0 {offsets = [64, 0], sizes = [32, 384], strides = [1, 1]} : vector<224x384xf32> to vector<32x384xf32>
    %cst_22 = arith.constant dense<0.000000e+00> : vector<16x384xf32>
    %54 = tpu.matmul %52, %53, %cst_22 {dimension_numbers = #tpu.dot_dimension_numbers<[1], [0], [0], [1], [0, 0, 1, 1], [], []>} : vector<16x32xf32>, vector<32x384xf32>, vector<16x384xf32> -> vector<16x384xf32>
    %55 = arith.addf %51, %54 : vector<16x384xf32>
    %56 = vector.extract_strided_slice %42 {offsets = [3, 0], sizes = [16, 32], strides = [1, 1]} : vector<24x32xf32> to vector<16x32xf32>
    %57 = vector.extract_strided_slice %0 {offsets = [96, 0], sizes = [32, 384], strides = [1, 1]} : vector<224x384xf32> to vector<32x384xf32>
    %cst_23 = arith.constant dense<0.000000e+00> : vector<16x384xf32>
    %58 = tpu.matmul %56, %57, %cst_23 {dimension_numbers = #tpu.dot_dimension_numbers<[1], [0], [0], [1], [0, 0, 1, 1], [], []>} : vector<16x32xf32>, vector<32x384xf32>, vector<16x384xf32> -> vector<16x384xf32>
    %59 = arith.addf %55, %58 : vector<16x384xf32>
    %60 = vector.extract_strided_slice %42 {offsets = [4, 0], sizes = [16, 32], strides = [1, 1]} : vector<24x32xf32> to vector<16x32xf32>
    %61 = vector.extract_strided_slice %0 {offsets = [128, 0], sizes = [32, 384], strides = [1, 1]} : vector<224x384xf32> to vector<32x384xf32>
    %cst_24 = arith.constant dense<0.000000e+00> : vector<16x384xf32>
    %62 = tpu.matmul %60, %61, %cst_24 {dimension_numbers = #tpu.dot_dimension_numbers<[1], [0], [0], [1], [0, 0, 1, 1], [], []>} : vector<16x32xf32>, vector<32x384xf32>, vector<16x384xf32> -> vector<16x384xf32>
    %63 = arith.addf %59, %62 : vector<16x384xf32>
    %64 = vector.extract_strided_slice %42 {offsets = [5, 0], sizes = [16, 32], strides = [1, 1]} : vector<24x32xf32> to vector<16x32xf32>
    %65 = vector.extract_strided_slice %0 {offsets = [160, 0], sizes = [32, 384], strides = [1, 1]} : vector<224x384xf32> to vector<32x384xf32>
    %cst_25 = arith.constant dense<0.000000e+00> : vector<16x384xf32>
    %66 = tpu.matmul %64, %65, %cst_25 {dimension_numbers = #tpu.dot_dimension_numbers<[1], [0], [0], [1], [0, 0, 1, 1], [], []>} : vector<16x32xf32>, vector<32x384xf32>, vector<16x384xf32> -> vector<16x384xf32>
    %67 = arith.addf %63, %66 : vector<16x384xf32>
    %68 = vector.extract_strided_slice %42 {offsets = [6, 0], sizes = [16, 32], strides = [1, 1]} : vector<24x32xf32> to vector<16x32xf32>
    %69 = vector.extract_strided_slice %0 {offsets = [192, 0], sizes = [32, 384], strides = [1, 1]} : vector<224x384xf32> to vector<32x384xf32>
    %cst_26 = arith.constant dense<0.000000e+00> : vector<16x384xf32>
    %70 = tpu.matmul %68, %69, %cst_26 {dimension_numbers = #tpu.dot_dimension_numbers<[1], [0], [0], [1], [0, 0, 1, 1], [], []>} : vector<16x32xf32>, vector<32x384xf32>, vector<16x384xf32> -> vector<16x384xf32>
    %71 = arith.addf %67, %70 : vector<16x384xf32>
    %72 = vector.broadcast %1 : vector<1x384xf32> to vector<16x384xf32>
    %73 = arith.addf %71, %72 : vector<16x384xf32>
    %cst_27 = arith.constant 0.000000e+00 : f32
    %74 = vector.broadcast %cst_27 : f32 to vector<16x384xf32>
    %75 = arith.maximumf %73, %74 : vector<16x384xf32>
    %76 = arith.mulf %75, %2 : vector<16x384xf32>
    %cst_28 = arith.constant dense<0xFF800000> : vector<384xf32>
    %77 = vector.multi_reduction <maximumf>, %76, %cst_28 [0] : vector<16x384xf32> to vector<384xf32>
    %78 = vector.shape_cast %77 : vector<384xf32> to vector<1x384xf32>
    %79 = tpu.concatenate %40, %78 in 0 : vector<1x384xf32>, vector<1x384xf32> -> vector<2x384xf32>
    %c0_29 = arith.constant 0 : index
    %c0_30 = arith.constant 0 : index
    %80 = vector.load %arg5[%c0_29, %c0_30] : memref<2x384xf32, #tpu.memory_space<vmem>>, vector<2x384xf32>
    tpu.vector_store %arg5[%c0_29, %c0_30], %79 {strides = array<i32>} : memref<2x384xf32, #tpu.memory_space<vmem>>, vector<2x384xf32>,
    return
  }
  func.func @transform_0(%arg0: i32) -> (i32, i32, i32) {
    %c0_i32 = arith.constant 0 : i32
    %c0_i32_0 = arith.constant 0 : i32
    %c0_i32_1 = arith.constant 0 : i32
    %c0_i32_2 = arith.constant 0 : i32
    return %c0_i32, %c0_i32_0, %c0_i32_1 : i32, i32, i32
  }
  func.func @transform_1(%arg0: i32) -> (i32, i32) {
    %c0_i32 = arith.constant 0 : i32
    %c0_i32_0 = arith.constant 0 : i32
    %c0_i32_1 = arith.constant 0 : i32
    return %c0_i32, %c0_i32_0 : i32, i32
  }
  func.func @transform_2(%arg0: i32) -> (i32, i32) {
    %c0_i32 = arith.constant 0 : i32
    %c0_i32_0 = arith.constant 0 : i32
    %c0_i32_1 = arith.constant 0 : i32
    return %c0_i32, %c0_i32_0 : i32, i32
  }
  func.func @transform_3(%arg0: i32) -> (i32, i32) {
    %c0_i32 = arith.constant 0 : i32
    %c0_i32_0 = arith.constant 0 : i32
    %c0_i32_1 = arith.constant 0 : i32
    return %c0_i32, %c0_i32_0 : i32, i32
  }
  func.func @transform_4(%arg0: i32) -> (i32, i32) {
    %c0_i32 = arith.constant 0 : i32
    %c0_i32_0 = arith.constant 0 : i32
    %c0_i32_1 = arith.constant 0 : i32
    return %c0_i32, %c0_i32_0 : i32, i32
  }
}

</mosaic_0001>

<bundles_post_ra>
// kernel: tpu_custom_call.1
= control target key start
LH: loop header
LB: loop body
LE: loop exit
PB: predicated region body
PF: predicated region fallthrough
CT: control target
= control target key end

     0   :  { %9 = vsyncpa [#allocation3], 0  ;;  %s3690_s0 = inlined_call_operand.hbm [shape: f32[2,24,32], index: 0, kind: input, shape index: {}]   ;;  %s3691_s1 = inlined_call_operand.hbm [shape: f32[224,384], index: 1, kind: input, shape index: {}]   ;;  %s3692_s2 = inlined_call_operand.vmem [shape: f32[1,384], index: 2, kind: input, shape index: {}]   ;;  %s3693_s3 = inlined_call_operand.hbm [shape: f32[16,384], index: 3, kind: input, shape index: {}]   ;;  %s3694_s4 = inlined_call_operand.hbm [shape: f32[2,384], index: 4, kind: output, shape index: {}]  }
   0x1   :  { %10 = vsyncpa [#allocation6], 0 }
   0x2   :  { %11 = vsyncpa [#allocation4], 0  ;;  %s2999_s15 = smov [#allocation5]  }
   0x3   :  { %s29_s16 = sshll.u32 %s2999_s15, 4  ;;  %s30_s16 = int_to_ptr.vmem [resolvable:$true] %s29_s16 }
   0x4   :  { %s2921_s17 = scalar_lea.vmem %s30_s16, 10752  ;;  %p2926_p1 = scmp.lt.s32.totalorder %s30_s16, %s30_s16 }
   0x5   :  { %p2922_p0 = scmp.ne.s32.totalorder %s30_s16, %s2921_s17  ;;  %p2927_p2 = scmp.lt.s32.totalorder %s2921_s17, %s2921_s17 }
   0x7   :  { %p2928_p3 = por %p2927_p2, %p2926_p1 }
   0x9   :  { %p2929_p4 = pnand %p2928_p3, %p2922_p0 }
   0xb   :  { %2932 = shalt.err (!%p2929_p4)
}
   0xc   :  { %s3000_s18 = smov 384   ;;  %s3001_s19 = smov 24  }
   0xd   :  { %35 = dma.hbm_to_vmem [thread:$0]  %s3691_s1, 10752, %s30_s16, [#allocation6], %s3000_s18, %s3000_s18, %s3001_s19  }
   0xe   :  { %s3002_s22 = smov [#allocation2]  }
   0xf   :  { %s17_s23 = sshll.u32 %s3002_s22, 4  ;;  %s18_s23 = int_to_ptr.vmem [resolvable:$true] %s17_s23 }
  0x10   :  { %s2941_s24 = scalar_lea.vmem %s18_s23, 768  ;;  %p2946_p6 = scmp.lt.s32.totalorder %s18_s23, %s18_s23 }
  0x11   :  { %p2942_p5 = scmp.ne.s32.totalorder %s18_s23, %s2941_s24  ;;  %p2947_p7 = scmp.lt.s32.totalorder %s2941_s24, %s2941_s24 }
  0x13   :  { %p2948_p8 = por %p2947_p7, %p2946_p6 }
  0x15   :  { %p2949_p9 = pnand %p2948_p8, %p2942_p5 }
  0x17   :  { %2952 = shalt.err (!%p2949_p9)
}
  0x18   :  { %s3003_s25 = smov 128   ;;  %s3004_s26 = smov 8  }
  0x19   :  { %23 = dma.hbm_to_vmem [thread:$0]  %s3690_s0, 768, %s18_s23, [#allocation3], %s3003_s25, %s3003_s25, %s3004_s26  }
  0x1a   :  { %s3005_s29 = smov [#allocation7]  }
  0x1b   :  { %s43_s30 = sshll.u32 %s3005_s29, 4  ;;  %s44_s30 = int_to_ptr.vmem [resolvable:$true] %s43_s30 }
  0x1c   :  { %s2961_s1 = scalar_lea.vmem %s44_s30, 768  ;;  %p2966_p11 = scmp.lt.s32.totalorder %s44_s30, %s44_s30 }
  0x1d   :  { %p2962_p10 = scmp.ne.s32.totalorder %s44_s30, %s2961_s1  ;;  %p2967_p12 = scmp.lt.s32.totalorder %s2961_s1, %s2961_s1 }
  0x1f   :  { %p2968_p13 = por %p2967_p12, %p2966_p11 }
  0x21   :  { %p2969_p0 = pnand %p2968_p13, %p2962_p10 }
  0x23   :  { %2972 = shalt.err (!%p2969_p0)
}
  0x24   :  { %49 = dma.hbm_to_vmem [thread:$0]  %s3693_s3, 768, %s44_s30, [#allocation6], %s3000_s18, %s3000_s18, %s3001_s19  }
  0x25   :  { %2993 = dma.done.wait [#allocation3], 768  }
  0x26   :  { %2994 = vsyncadd [#allocation3], 4294966528 }
  0x27   :  { %2995 = dma.done.wait [#allocation6], 11520  }
  0x28   :  { %2996 = vsyncadd [#allocation6], 4294955776  ;;  %v3695_v0 = vmov 0.0   ;;  %v3044_v1 = vld [vmem:[#allocation5 + $0xb0] sm:$0xff]  ;;  %v3046_v2 = vld [vmem:[#allocation5 + $0xb8] sm:$0xff]  ;;  %vm156_vm0 = vcmask 1046528  }
  0x29   :  { %231 = vmatprep.mubr.f32.mxu0 %v3695_v0  ;;  %v3048_v3 = vld [vmem:[#allocation5 + $0xa8] sm:$0xff]  ;;  %191 = vmatprep.subr.mxu0 %v3044_v1  ;;  %v3052_v4 = vld [vmem:[#allocation5 + $0x98] sm:$0xff]  ;;  %v3054_v5 = vld [vmem:[#allocation5 + $0xa0] sm:$0xff]  ;;  %vm162_vm1 = vcmask 261120   ;;  %vm1147_vm2 = vcmask 1041408   ;;  %vm475_vm3 = vcmask 1045504  }
  0x2a   :  { %2749 = vmatprep.subr.mxu1 %v3046_v2  ;;  %v3056_v6 = vld [vmem:[#allocation5 + $0x90] sm:$0xff]  ;;  %192 = vmatpush1.msra.mxu0 %v3048_v3  ;;  %v3060_v7 = vld [vmem:[#allocation5 + $0x80] sm:$0xff]  ;;  %v3062_v8 = vld [vmem:[#allocation5 + $0x88] sm:$0xff]  ;;  %vm643_vm4 = vcmask 1044480   ;;  %vm811_vm5 = vcmask 1043456   ;;  %vm979_vm6 = vcmask 1042432  }
  0x2b   :  { %2750 = vmatpush3.msra.mxu1 %v3046_v2  ;;  %193 = vmatprep.subr.mxu0 %v3052_v4  ;;  %v3066_v9 = vld [vmem:[#allocation5 + $0x78] sm:$0xff]  ;;  %v3068_v10 = vld [vmem:[#allocation5 + $0x68] sm:$0xff]  ;;  %v3072_v11 = vld [vmem:[#allocation5 + $0x70] sm:$0xff]  ;;  %vm2568_vm7 = vcmask 1040384  }
  0x2c   :  { %2751 = vmatprep.subr.mxu1 %v3054_v5  ;;  %194 = vmatpush1.msra.mxu0 %v3056_v6  ;;  %v3074_v12 = vld [vmem:[#allocation2] sm:$0xff]  ;;  %v3076_v13 = vld [vmem:[#allocation2 + $0x8] sm:$0xff]  ;;  %v3080_v14 = vld [vmem:[#allocation5 + $0x60] sm:$0xff] }
  0x2d   :  { %2752 = vmatpush3.msra.mxu1 %v3054_v5  ;;  %195 = vmatprep.subr.mxu0 %v3060_v7  ;;  %v157_v15 = vrot.slane %v3074_v12, 1  ;;  %v158_v16 = vrot.slane %v3076_v13, 1  ;;  %v3084_v17 = vld [vmem:[#allocation2 + $0x10] sm:$0xff]  ;;  %v3092_v20 = vld [vmem:[#allocation5 + $0x50] sm:$0xff]  ;;  %v3094_v21 = vld [vmem:[#allocation5 + $0x58] sm:$0xff]  ;;  %v1148_v27 = vrot.slane %v3074_v12, 6 }
  0x2e   :  { %2753 = vmatprep.subr.mxu1 %v3062_v8  ;;  %196 = vmatpush1.msra.mxu0 %v3066_v9  ;;  %v160_v18 = vrot.slane %v3084_v17, 1  ;;  %v3099_v23 = vld [vmem:[#allocation5 + $0x48] sm:$0xff]  ;;  %v3103_v24 = vld [vmem:[#allocation5 + $0x38] sm:$0xff]  ;;  %v3107_v25 = vld [vmem:[#allocation5 + $0x40] sm:$0xff]  ;;  %v1149_v28 = vrot.slane %v3076_v13, 6  ;;  %v1151_v30 = vrot.slane %v3084_v17, 6 }
  0x2f   :  { %2754 = vmatpush3.msra.mxu1 %v3062_v8  ;;  %197 = vmatprep.subr.mxu0 %v3068_v10  ;;  %v159_v19 = vsel %vm156_vm0, %v157_v15, %v158_v16  ;;  %v3111_v26 = vld [vmem:[#allocation5 + $0x30] sm:$0xff]  ;;  %v3117_v29 = vld [vmem:[#allocation5 + $0x20] sm:$0xff]  ;;  %v3122_v31 = vld [vmem:[#allocation5 + $0x28] sm:$0xff]  ;;  %v476_v47 = vrot.slane %v3074_v12, 2  ;;  %v477_v48 = vrot.slane %v3076_v13, 2  ;;  %v479_v50 = vrot.slane %v3084_v17, 2 }
  0x30   :  { %2755 = vmatprep.subr.mxu1 %v3072_v11  ;;  %198 = vmatpush1.msra.mxu0 %v3080_v14  ;;  %v161_v22 = vsel %vm156_vm0, %v158_v16, %v160_v18  ;;  %v3124_v32 = vld [vmem:[#allocation5 + $0x18] sm:$0xff]  ;;  %v3127_v33 = vsel %vm1147_vm2, %v1148_v27, %v1149_v28  ;;  %v3131_v34 = vld [vmem:[#allocation5 + $0x8] sm:$0xff]  ;;  %v3134_v35 = vsel %vm1147_vm2, %v1149_v28, %v1151_v30  ;;  %v3138_v36 = vld [vmem:[#allocation5 + $0x10] sm:$0xff]  ;;  %v644_v16 = vrot.slane %v3074_v12, 3 }
  0x31   :  { %2756 = vmatpush3.msra.mxu1 %v3072_v11  ;;  %2609 = vmatmul.mubr.msk.f32.vlgmr.msra.gmra.mxu0 %vm162_vm1, %v159_v19  ;;  %v3140_v37 = vld [vmem:[#allocation5] sm:$0xff]  ;;  %v3148_v38 = vld [vmem:[#allocation5 + $0x110] sm:$0xff]  ;;  %v3152_v39 = vld [vmem:[#allocation5 + $0x118] sm:$0xff]  ;;  %v478_v53 = vsel %vm475_vm3, %v476_v47, %v477_v48  ;;  %v480_v54 = vsel %vm475_vm3, %v477_v48, %v479_v50  ;;  %v645_v18 = vrot.slane %v3076_v13, 3  ;;  %v647_v28 = vrot.slane %v3084_v17, 3 }
  0x32   :  { %2757 = vmatprep.mubr.msk.f32.mxu1 %vm162_vm1, %v159_v19  ;;  %347 = vmatprep.subr.mxu0 %v3092_v20  ;;  %v3154_v40 = vld [vmem:[#allocation5 + $0x108] sm:$0xff]  ;;  %v3160_v41 = vld [vmem:[#allocation5 + $0xf8] sm:$0xff]  ;;  %v3165_v42 = vld [vmem:[#allocation5 + $0x100] sm:$0xff] }
  0x33   :  { %2760 = vmatprep.subr.mxu1 %v3094_v21  ;;  %2758 = vmatmul.mubr.msk.f32.vlgmr.msra.gmra.mxu1 %vm162_vm1, %v161_v22  ;;  %v3169_v43 = vld [vmem:[#allocation5 + $0xf0] sm:$0xff]  ;;  %v3173_v44 = vld [vmem:[#allocation5 + $0xe0] sm:$0xff]  ;;  %v3177_v45 = vld [vmem:[#allocation5 + $0xe8] sm:$0xff] }
  0x34   :  { %348 = vmatpush1.msra.mxu0 %v3099_v23  ;;  %2761 = vmatpush3.msra.mxu1 %v3094_v21  ;;  %v3179_v46 = vld [vmem:[#allocation5 + $0xd8] sm:$0xff]  ;;  %v3185_v49 = vld [vmem:[#allocation5 + $0xc8] sm:$0xff]  ;;  %v3191_v51 = vld [vmem:[#allocation5 + $0xd0] sm:$0xff] }
  0x35   :  { %349 = vmatprep.subr.mxu0 %v3103_v24  ;;  %2762 = vmatprep.subr.mxu1 %v3107_v25  ;;  %v3193_v52 = vld [vmem:[#allocation5 + $0xc0] sm:$0xff]  ;;  %v3203_v55 = vld [vmem:[#allocation5 + $0x170] sm:$0xff]  ;;  %v3207_v56 = vld [vmem:[#allocation5 + $0x178] sm:$0xff] }
  0x36   :  { %237 = vmatprep.mubr.f32.mxu0 %v3695_v0  ;;  %350 = vmatpush1.msra.mxu0 %v3111_v26  ;;  %v3209_v57 = vld [vmem:[#allocation5 + $0x168] sm:$0xff]  ;;  %v3213_v58 = vld [vmem:[#allocation5 + $0x158] sm:$0xff]  ;;  %v3217_v59 = vld [vmem:[#allocation5 + $0x160] sm:$0xff] }
  0x37   :  { %2763 = vmatpush3.msra.mxu1 %v3107_v25  ;;  %2610 = vmatmul.mubr.msk.f32.gmra.mxu0 %vm162_vm1, %v161_v22  ;;  %v3221_v60 = vld [vmem:[#allocation5 + $0x150] sm:$0xff]  ;;  %v3225_v61 = vld [vmem:[#allocation5 + $0x140] sm:$0xff]  ;;  %v3231_v63 = vld [vmem:[#allocation5 + $0x148] sm:$0xff] }
  0x38   :  { %351 = vmatprep.subr.mxu0 %v3117_v29  ;;  %2764 = vmatprep.subr.mxu1 %v3122_v31  ;;  %v3227_v62 = vld [vmem:[#allocation2 + $0x20] sm:$0xff]  ;;  %v3233_v15 = vld [vmem:[#allocation5 + $0x138] sm:$0xff]  ;;  %v3242_v27 = vld [vmem:[#allocation5 + $0x128] sm:$0xff] }
  0x39   :  { %352 = vmatpush1.msra.mxu0 %v3124_v32  ;;  %2765 = vmatpush3.msra.mxu1 %v3122_v31  ;;  %3733 = vst [vmem:[#allocation12_spill] sm:$0xff] %v3233_v15  ;;  %v3237_v19 = vld [vmem:[#allocation2 + $0x28] sm:$0xff]  ;;  %v3698_v22 = vrot.slane %v3227_v62, 6  ;;  %3734 = vst [vmem:[#allocation13_spill] sm:$0xff] %v3242_v27  ;;  %v3248_v47 = vld [vmem:[#allocation5 + $0x130] sm:$0xff] }
  0x3a   :  { %353 = vmatprep.subr.mxu0 %v3131_v34  ;;  %2766 = vmatprep.subr.mxu1 %v3138_v36  ;;  %v2365_v30 = vrot.slane %v3237_v19, 6  ;;  %3735 = vst [vmem:[#allocation14_spill] sm:$0xff] %v3248_v47  ;;  %v3250_v48 = vld [vmem:[#allocation5 + $0x120] sm:$0xff] }
  0x3b   :  { %354 = vmatpush1.msra.mxu0 %v3140_v37  ;;  %387 = vmatprep.mubr.f32.mxu0 %v3695_v0  ;;  %3736 = vst [vmem:[#allocation15_spill] sm:$0xff] %v3250_v48 }
  0x3c   :  { %2767 = vmatpush3.msra.mxu1 %v3138_v36  ;;  %2768 = vmatprep.mubr.msk.f32.mxu1 %vm162_vm1, %v3074_v12  ;;  %v3257_v50 = vsel %vm1147_vm2, %v3698_v22, %v2365_v30  ;;  %v3269_v30 = vld [vmem:[#allocation5 + $0x1d8] sm:$0xff]  ;;  %v3271_v22 = vld [vmem:[#allocation5 + $0x1c8] sm:$0xff] }
  0x3d   :  { %2613 = vmatmul.mubr.msk.f32.vlgmr.msra.gmra.mxu0 %vm162_vm1, %v3074_v12  ;;  %2769 = vmatmul.mubr.msk.f32.vlgmr.msra.gmra.mxu1 %vm162_vm1, %v3076_v13  ;;  %3737 = vst [vmem:[#allocation16_spill] sm:$0xff] %v3257_v50  ;;  %3740 = vst [vmem:[#allocation18_spill] sm:$0xff] %v3269_v30  ;;  %v3287_v50 = vld [vmem:[#allocation5 + $0x1a0] sm:$0xff] }
  0x3e   :  { %509 = vmatprep.subr.mxu0 %v3148_v38  ;;  %2771 = vmatprep.subr.mxu1 %v3152_v39  ;;  %3741 = vst [vmem:[#allocation19_spill] sm:$0xff] %v3271_v22  ;;  %3745 = vst [vmem:[#allocation23_spill] sm:$0xff] %v3287_v50 }
  0x3f   :  { %510 = vmatpush1.msra.mxu0 %v3154_v40  ;;  %2772 = vmatpush3.msra.mxu1 %v3152_v39 }
  0x40   :  { %511 = vmatprep.subr.mxu0 %v3160_v41  ;;  %2773 = vmatprep.subr.mxu1 %v3165_v42 }
  0x41   :  { %393 = vmatprep.mubr.f32.mxu0 %v3695_v0  ;;  %512 = vmatpush1.msra.mxu0 %v3169_v43 }
  0x42   :  { %2774 = vmatpush3.msra.mxu1 %v3165_v42  ;;  %2614 = vmatmul.mubr.msk.f32.gmra.mxu0 %vm162_vm1, %v3076_v13 }
  0x43   :  { %513 = vmatprep.subr.mxu0 %v3173_v44  ;;  %2775 = vmatprep.subr.mxu1 %v3177_v45 }
  0x44   :  { %514 = vmatpush1.msra.mxu0 %v3179_v46  ;;  %2776 = vmatpush3.msra.mxu1 %v3177_v45 }
  0x45   :  { %515 = vmatprep.subr.mxu0 %v3185_v49  ;;  %2777 = vmatprep.subr.mxu1 %v3191_v51 }
  0x46   :  { %516 = vmatpush1.msra.mxu0 %v3193_v52  ;;  %549 = vmatprep.mubr.f32.mxu0 %v3695_v0 }
  0x47   :  { %2778 = vmatpush3.msra.mxu1 %v3191_v51  ;;  %2779 = vmatprep.mubr.msk.f32.mxu1 %vm162_vm1, %v478_v53 }
  0x48   :  { %2617 = vmatmul.mubr.msk.f32.vlgmr.msra.gmra.mxu0 %vm162_vm1, %v478_v53  ;;  %2780 = vmatmul.mubr.msk.f32.vlgmr.msra.gmra.mxu1 %vm162_vm1, %v480_v54  ;;  %v646_v53 = vsel %vm643_vm4, %v644_v16, %v645_v18  ;;  %v3275_v16 = vld [vmem:[#allocation5 + $0x1b8] sm:$0xff] }
  0x49   :  { %677 = vmatprep.subr.mxu0 %v3203_v55  ;;  %2782 = vmatprep.subr.mxu1 %v3207_v56  ;;  %3742 = vst [vmem:[#allocation20_spill] sm:$0xff] %v3275_v16 }
  0x4a   :  { %678 = vmatpush1.msra.mxu0 %v3209_v57  ;;  %2783 = vmatpush3.msra.mxu1 %v3207_v56 }
  0x4b   :  { %679 = vmatprep.subr.mxu0 %v3213_v58  ;;  %2784 = vmatprep.subr.mxu1 %v3217_v59 }
  0x4c   :  { %555 = vmatprep.mubr.f32.mxu0 %v3695_v0  ;;  %680 = vmatpush1.msra.mxu0 %v3221_v60  ;;  %v3265_v0 = vld [vmem:[#allocation5 + $0x1d0] sm:$0xff] }
  0x4d   :  { %2785 = vmatpush3.msra.mxu1 %v3217_v59  ;;  %2618 = vmatmul.mubr.msk.f32.gmra.mxu0 %vm162_vm1, %v480_v54  ;;  %v648_v54 = vsel %vm643_vm4, %v645_v18, %v647_v28  ;;  %3738 = vst [vmem:[#allocation17_spill] sm:$0xff] %v3265_v0  ;;  %v3279_v18 = vld [vmem:[#allocation5 + $0x1c0] sm:$0xff]  ;;  %v3283_v28 = vld [vmem:[#allocation5 + $0x1b0] sm:$0xff] }
  0x4e   :  { %681 = vmatprep.subr.mxu0 %v3225_v61  ;;  %2786 = vmatprep.subr.mxu1 %v3231_v63  ;;  %3743 = vst [vmem:[#allocation21_spill] sm:$0xff] %v3279_v18  ;;  %3744 = vst [vmem:[#allocation22_spill] sm:$0xff] %v3283_v28 }
  0x4f   :  { %682 = vmatpush1.msra.mxu0 %v3233_v15  ;;  %2787 = vmatpush3.msra.mxu1 %v3231_v63  ;;  %v3739_v15 = vmov 0.0  }
  0x50   :  { %683 = vmatprep.subr.mxu0 %v3242_v27  ;;  %2788 = vmatprep.subr.mxu1 %v3248_v47  ;;  %v3306_v27 = vld [vmem:[#allocation5 + $0x180] sm:$0xff] }
  0x51   :  { %684 = vmatpush1.msra.mxu0 %v3250_v48  ;;  %717 = vmatprep.mubr.f32.mxu0 %v3739_v15  ;;  %v812_v48 = vrot.slane %v3074_v12, 4  ;;  %3750 = vst [vmem:[#allocation28_spill] sm:$0xff] %v3306_v27 }
  0x52   :  { %2789 = vmatpush3.msra.mxu1 %v3248_v47  ;;  %2790 = vmatprep.mubr.msk.f32.mxu1 %vm162_vm1, %v646_v53  ;;  %v3304_v47 = vld [vmem:[#allocation5 + $0x190] sm:$0xff] }
  0x53   :  { %2621 = vmatmul.mubr.msk.f32.vlgmr.msra.gmra.mxu0 %vm162_vm1, %v646_v53  ;;  %2791 = vmatmul.mubr.msk.f32.vlgmr.msra.gmra.mxu1 %vm162_vm1, %v648_v54  ;;  %v3291_v53 = vld [vmem:[#allocation5 + $0x1a8] sm:$0xff]  ;;  %3749 = vst [vmem:[#allocation27_spill] sm:$0xff] %v3304_v47 }
  0x54   :  { %845 = vmatprep.subr.mxu0 %v3265_v0  ;;  %2793 = vmatprep.subr.mxu1 %v3269_v30  ;;  %3746 = vst [vmem:[#allocation24_spill] sm:$0xff] %v3291_v53  ;;  %v3293_v0 = vld [vmem:[#allocation5 + $0x198] sm:$0xff] }
  0x55   :  { %846 = vmatpush1.msra.mxu0 %v3271_v22  ;;  %2794 = vmatpush3.msra.mxu1 %v3269_v30  ;;  %3747 = vst [vmem:[#allocation25_spill] sm:$0xff] %v3293_v0  ;;  %v813_v22 = vrot.slane %v3076_v13, 4  ;;  %v3299_v30 = vld [vmem:[#allocation5 + $0x188] sm:$0xff] }
  0x56   :  { %847 = vmatprep.subr.mxu0 %v3275_v16  ;;  %2795 = vmatprep.subr.mxu1 %v3279_v18  ;;  %3748 = vst [vmem:[#allocation26_spill] sm:$0xff] %v3299_v30  ;;  %v815_v16 = vrot.slane %v3084_v17, 4 }
  0x57   :  { %723 = vmatprep.mubr.f32.mxu0 %v3739_v15  ;;  %848 = vmatpush1.msra.mxu0 %v3283_v28  ;;  %v814_v28 = vsel %vm811_vm5, %v812_v48, %v813_v22  ;;  %v3326_v48 = vld [vmem:[#allocation5 + $0x218] sm:$0xff] }
  0x58   :  { %2796 = vmatpush3.msra.mxu1 %v3279_v18  ;;  %2622 = vmatmul.mubr.msk.f32.gmra.mxu0 %vm162_vm1, %v648_v54  ;;  %v816_v54 = vsel %vm811_vm5, %v813_v22, %v815_v16  ;;  %v3320_v18 = vld [vmem:[#allocation5 + $0x238] sm:$0xff]  ;;  %3754 = vst [vmem:[#allocation32_spill] sm:$0xff] %v3326_v48  ;;  %v3330_v22 = vld [vmem:[#allocation5 + $0x220] sm:$0xff]  ;;  %v3334_v16 = vld [vmem:[#allocation5 + $0x210] sm:$0xff] }
  0x59   :  { %849 = vmatprep.subr.mxu0 %v3287_v50  ;;  %2797 = vmatprep.subr.mxu1 %v3291_v53  ;;  %v3316_v50 = vld [vmem:[#allocation5 + $0x230] sm:$0xff]  ;;  %3752 = vst [vmem:[#allocation30_spill] sm:$0xff] %v3320_v18 }
  0x5a   :  { %850 = vmatpush1.msra.mxu0 %v3293_v0  ;;  %2798 = vmatpush3.msra.mxu1 %v3291_v53  ;;  %3751 = vst [vmem:[#allocation29_spill] sm:$0xff] %v3316_v50  ;;  %v3322_v0 = vld [vmem:[#allocation5 + $0x228] sm:$0xff]  ;;  %v3357_v53 = vld [vmem:[#allocation5 + $0x1e0] sm:$0xff] }
  0x5b   :  { %851 = vmatprep.subr.mxu0 %v3299_v30  ;;  %2799 = vmatprep.subr.mxu1 %v3304_v47  ;;  %3753 = vst [vmem:[#allocation31_spill] sm:$0xff] %v3322_v0  ;;  %v3355_v30 = vld [vmem:[#allocation5 + $0x1f0] sm:$0xff]  ;;  %3756 = vst [vmem:[#allocation34_spill] sm:$0xff] %v3357_v53 }
  0x5c   :  { %852 = vmatpush1.msra.mxu0 %v3306_v27  ;;  %885 = vmatprep.mubr.f32.mxu0 %v3739_v15  ;;  %v3338_v27 = vld [vmem:[#allocation5 + $0x200] sm:$0xff] }
  0x5d   :  { %2800 = vmatpush3.msra.mxu1 %v3304_v47  ;;  %2801 = vmatprep.mubr.msk.f32.mxu1 %vm162_vm1, %v814_v28  ;;  %v980_v47 = vrot.slane %v3074_v12, 5 }
  0x5e   :  { %2625 = vmatmul.mubr.msk.f32.vlgmr.msra.gmra.mxu0 %vm162_vm1, %v814_v28  ;;  %2802 = vmatmul.mubr.msk.f32.vlgmr.msra.gmra.mxu1 %vm162_vm1, %v816_v54  ;;  %v3342_v28 = vld [vmem:[#allocation5 + $0x208] sm:$0xff] }
  0x5f   :  { %1013 = vmatprep.subr.mxu0 %v3316_v50  ;;  %2804 = vmatprep.subr.mxu1 %v3320_v18  ;;  %v3344_v50 = vld [vmem:[#allocation5 + $0x1f8] sm:$0xff] }
  0x60   :  { %1014 = vmatpush1.msra.mxu0 %v3322_v0  ;;  %2805 = vmatpush3.msra.mxu1 %v3320_v18  ;;  %3755 = vst [vmem:[#allocation33_spill] sm:$0xff] %v3344_v50  ;;  %v981_v0 = vrot.slane %v3076_v13, 5  ;;  %v3350_v18 = vld [vmem:[#allocation5 + $0x1e8] sm:$0xff] }
  0x61   :  { %1015 = vmatprep.subr.mxu0 %v3326_v48  ;;  %2806 = vmatprep.subr.mxu1 %v3330_v22  ;;  %v983_v48 = vrot.slane %v3084_v17, 5  ;;  %v3367_v17 = vld [vmem:[#allocation5 + $0x290] sm:$0xff] }
  0x62   :  { %891 = vmatprep.mubr.f32.mxu0 %v3739_v15  ;;  %1016 = vmatpush1.msra.mxu0 %v3334_v16  ;;  %v982_v12 = vsel %vm979_vm6, %v980_v47, %v981_v0  ;;  %3757 = vst [vmem:[#allocation35_spill] sm:$0xff] %v3367_v17  ;;  %v3377_v47 = vld [vmem:[#allocation5 + $0x278] sm:$0xff] }
  0x63   :  { %2807 = vmatpush3.msra.mxu1 %v3330_v22  ;;  %2626 = vmatmul.mubr.msk.f32.gmra.mxu0 %vm162_vm1, %v816_v54  ;;  %v984_v13 = vsel %vm979_vm6, %v981_v0, %v983_v48  ;;  %v3371_v54 = vld [vmem:[#allocation5 + $0x298] sm:$0xff]  ;;  %3760 = vst [vmem:[#allocation38_spill] sm:$0xff] %v3377_v47  ;;  %v3381_v0 = vld [vmem:[#allocation5 + $0x280] sm:$0xff]  ;;  %v3385_v48 = vld [vmem:[#allocation5 + $0x270] sm:$0xff] }
  0x64   :  { %1017 = vmatprep.subr.mxu0 %v3338_v27  ;;  %2808 = vmatprep.subr.mxu1 %v3342_v28  ;;  %3758 = vst [vmem:[#allocation36_spill] sm:$0xff] %v3371_v54 }
  0x65   :  { %1018 = vmatpush1.msra.mxu0 %v3344_v50  ;;  %2809 = vmatpush3.msra.mxu1 %v3342_v28  ;;  %v3373_v50 = vld [vmem:[#allocation5 + $0x288] sm:$0xff] }
  0x66   :  { %1019 = vmatprep.subr.mxu0 %v3350_v18  ;;  %2810 = vmatprep.subr.mxu1 %v3355_v30  ;;  %3759 = vst [vmem:[#allocation37_spill] sm:$0xff] %v3373_v50 }
  0x67   :  { %1020 = vmatpush1.msra.mxu0 %v3357_v53  ;;  %1053 = vmatprep.mubr.f32.mxu0 %v3739_v15  ;;  %v3389_v53 = vld [vmem:[#allocation5 + $0x260] sm:$0xff] }
  0x68   :  { %2811 = vmatpush3.msra.mxu1 %v3355_v30  ;;  %2812 = vmatprep.mubr.msk.f32.mxu1 %vm162_vm1, %v982_v12 }
  0x69   :  { %2629 = vmatmul.mubr.msk.f32.vlgmr.msra.gmra.mxu0 %vm162_vm1, %v982_v12  ;;  %2813 = vmatmul.mubr.msk.f32.vlgmr.msra.gmra.mxu1 %vm162_vm1, %v984_v13  ;;  %v3393_v12 = vld [vmem:[#allocation5 + $0x268] sm:$0xff] }
  0x6a   :  { %1181 = vmatprep.subr.mxu0 %v3367_v17  ;;  %2815 = vmatprep.subr.mxu1 %v3371_v54  ;;  %v3395_v17 = vld [vmem:[#allocation5 + $0x258] sm:$0xff] }
  0x6b   :  { %1182 = vmatpush1.msra.mxu0 %v3373_v50  ;;  %2816 = vmatpush3.msra.mxu1 %v3371_v54  ;;  %v3399_v50 = vld [vmem:[#allocation5 + $0x248] sm:$0xff]  ;;  %v3405_v54 = vld [vmem:[#allocation5 + $0x240] sm:$0xff] }
  0x6c   :  { %1183 = vmatprep.subr.mxu0 %v3377_v47  ;;  %2817 = vmatprep.subr.mxu1 %v3381_v0  ;;  %v3403_v47 = vld [vmem:[#allocation5 + $0x250] sm:$0xff]  ;;  %3761 = vst [vmem:[#allocation39_spill] sm:$0xff] %v3405_v54 }
  0x6d   :  { %1059 = vmatprep.mubr.f32.mxu0 %v3739_v15  ;;  %1184 = vmatpush1.msra.mxu0 %v3385_v48 }
  0x6e   :  { %2818 = vmatpush3.msra.mxu1 %v3381_v0  ;;  %2630 = vmatmul.mubr.msk.f32.gmra.mxu0 %vm162_vm1, %v984_v13  ;;  %v3422_v13 = vld [vmem:[#allocation2 + $0x18] sm:$0xff] }
  0x6f   :  { %1185 = vmatprep.subr.mxu0 %v3389_v53  ;;  %2819 = vmatprep.subr.mxu1 %v3393_v12 }
  0x70   :  { %1186 = vmatpush1.msra.mxu0 %v3395_v17  ;;  %2820 = vmatpush3.msra.mxu1 %v3393_v12 }
  0x71   :  { %1187 = vmatprep.subr.mxu0 %v3399_v50  ;;  %2821 = vmatprep.subr.mxu1 %v3403_v47 }
  0x72   :  { %1188 = vmatpush1.msra.mxu0 %v3405_v54  ;;  %1221 = vmatprep.mubr.f32.mxu0 %v3739_v15  ;;  %v1378_v54 = vrot.slane %v3227_v62, 1 }
  0x73   :  { %2822 = vmatpush3.msra.mxu1 %v3403_v47  ;;  %2823 = vmatprep.mubr.msk.f32.mxu1 %vm162_vm1, %v3127_v33 }
  0x74   :  { %2633 = vmatmul.mubr.msk.f32.vlgmr.msra.gmra.mxu0 %vm162_vm1, %v3127_v33  ;;  %2824 = vmatmul.mubr.msk.f32.vlgmr.msra.gmra.mxu1 %vm162_vm1, %v3134_v35  ;;  %v1377_v33 = vrot.slane %v3422_v13, 1 }
  0x75   :  { %1410 = vmatprep.subr.mxu0 %v3044_v1  ;;  %2826 = vmatprep.subr.mxu1 %v3046_v2  ;;  %v1380_v1 = vrot.slane %v3237_v19, 1 }
  0x76   :  { %1411 = vmatpush1.msra.mxu0 %v3048_v3  ;;  %2827 = vmatpush3.msra.mxu1 %v3046_v2  ;;  %v1379_v2 = vsel %vm156_vm0, %v1377_v33, %v1378_v54 }
  0x77   :  { %1412 = vmatprep.subr.mxu0 %v3052_v4  ;;  %2828 = vmatprep.subr.mxu1 %v3054_v5  ;;  %v1381_v3 = vsel %vm156_vm0, %v1378_v54, %v1380_v1  ;;  %v1694_v4 = vrot.slane %v3422_v13, 2  ;;  %v3789_v54 = vld [vmem:[#allocation39_spill] sm:$0xff] }
  0x78   :  { %1227 = vmatprep.mubr.f32.mxu0 %v3739_v15  ;;  %1413 = vmatpush1.msra.mxu0 %v3056_v6  ;;  %v1697_v6 = vrot.slane %v3237_v19, 2 }
  0x79   :  { %2829 = vmatpush3.msra.mxu1 %v3054_v5  ;;  %2634 = vmatmul.mubr.msk.f32.gmra.mxu0 %vm162_vm1, %v3134_v35  ;;  %v1695_v5 = vrot.slane %v3227_v62, 2  ;;  %v2028_v35 = vrot.slane %v3422_v13, 4 }
  0x7a   :  { %1414 = vmatprep.subr.mxu0 %v3060_v7  ;;  %2830 = vmatprep.subr.mxu1 %v3062_v8 }
  0x7b   :  { %1415 = vmatpush1.msra.mxu0 %v3066_v9  ;;  %2831 = vmatpush3.msra.mxu1 %v3062_v8  ;;  %v1696_v7 = vsel %vm475_vm3, %v1694_v4, %v1695_v5  ;;  %v1698_v8 = vsel %vm475_vm3, %v1695_v5, %v1697_v6  ;;  %v1861_v9 = vrot.slane %v3422_v13, 3 }
  0x7c   :  { %1416 = vmatprep.subr.mxu0 %v3068_v10  ;;  %2832 = vmatprep.subr.mxu1 %v3072_v11  ;;  %v1862_v10 = vrot.slane %v3227_v62, 3 }
  0x7d   :  { %1417 = vmatpush1.msra.mxu0 %v3080_v14  ;;  %1450 = vmatprep.mubr.f32.mxu0 %v3739_v15  ;;  %v3762_v14 = vld [vmem:[#allocation12_spill] sm:$0xff] }
  0x7e   :  { %2833 = vmatpush3.msra.mxu1 %v3072_v11  ;;  %2637 = vmatmul.mubr.msk.f32.vlgmr.msra.gmra.mxu0 %vm162_vm1, %v1379_v2  ;;  %v1864_v11 = vrot.slane %v3237_v19, 3 }
  0x7f   :  { %2834 = vmatprep.mubr.msk.f32.mxu1 %vm162_vm1, %v1379_v2  ;;  %1566 = vmatprep.subr.mxu0 %v3092_v20  ;;  %v3763_v20 = vld [vmem:[#allocation13_spill] sm:$0xff] }
  0x80   :  { %2837 = vmatprep.subr.mxu1 %v3094_v21  ;;  %2835 = vmatmul.mubr.msk.f32.vlgmr.msra.gmra.mxu1 %vm162_vm1, %v1381_v3 }
  0x81   :  { %1567 = vmatpush1.msra.mxu0 %v3099_v23  ;;  %2838 = vmatpush3.msra.mxu1 %v3094_v21  ;;  %v1863_v21 = vsel %vm643_vm4, %v1861_v9, %v1862_v10  ;;  %v3764_v23 = vld [vmem:[#allocation14_spill] sm:$0xff] }
  0x82   :  { %1568 = vmatprep.subr.mxu0 %v3103_v24  ;;  %2839 = vmatprep.subr.mxu1 %v3107_v25  ;;  %v3765_v24 = vld [vmem:[#allocation15_spill] sm:$0xff] }
  0x83   :  { %1456 = vmatprep.mubr.f32.mxu0 %v3739_v15  ;;  %1569 = vmatpush1.msra.mxu0 %v3111_v26  ;;  %v3766_v26 = vld [vmem:[#allocation17_spill] sm:$0xff] }
  0x84   :  { %2840 = vmatpush3.msra.mxu1 %v3107_v25  ;;  %2638 = vmatmul.mubr.msk.f32.gmra.mxu0 %vm162_vm1, %v1381_v3  ;;  %v1865_v25 = vsel %vm643_vm4, %v1862_v10, %v1864_v11 }
  0x85   :  { %1570 = vmatprep.subr.mxu0 %v3117_v29  ;;  %2841 = vmatprep.subr.mxu1 %v3122_v31  ;;  %v3767_v29 = vld [vmem:[#allocation18_spill] sm:$0xff] }
  0x86   :  { %1571 = vmatpush1.msra.mxu0 %v3124_v32  ;;  %2842 = vmatpush3.msra.mxu1 %v3122_v31  ;;  %v3768_v31 = vld [vmem:[#allocation19_spill] sm:$0xff]  ;;  %v3769_v32 = vld [vmem:[#allocation20_spill] sm:$0xff] }
  0x87   :  { %1572 = vmatprep.subr.mxu0 %v3131_v34  ;;  %2843 = vmatprep.subr.mxu1 %v3138_v36  ;;  %v3770_v34 = vld [vmem:[#allocation21_spill] sm:$0xff] }
  0x88   :  { %1573 = vmatpush1.msra.mxu0 %v3140_v37  ;;  %1606 = vmatprep.mubr.f32.mxu0 %v3739_v15  ;;  %v3771_v37 = vld [vmem:[#allocation22_spill] sm:$0xff] }
  0x89   :  { %2844 = vmatpush3.msra.mxu1 %v3138_v36  ;;  %2845 = vmatprep.mubr.msk.f32.mxu1 %vm162_vm1, %v3422_v13  ;;  %v2029_v36 = vrot.slane %v3227_v62, 4 }
  0x8a   :  { %2641 = vmatmul.mubr.msk.f32.vlgmr.msra.gmra.mxu0 %vm162_vm1, %v3422_v13  ;;  %2846 = vmatmul.mubr.msk.f32.vlgmr.msra.gmra.mxu1 %vm162_vm1, %v3227_v62 }
  0x8b   :  { %1727 = vmatprep.subr.mxu0 %v3148_v38  ;;  %2848 = vmatprep.subr.mxu1 %v3152_v39  ;;  %v2031_v38 = vrot.slane %v3237_v19, 4 }
  0x8c   :  { %1728 = vmatpush1.msra.mxu0 %v3154_v40  ;;  %2849 = vmatpush3.msra.mxu1 %v3152_v39  ;;  %v3772_v39 = vld [vmem:[#allocation23_spill] sm:$0xff]  ;;  %v3773_v40 = vld [vmem:[#allocation24_spill] sm:$0xff] }
  0x8d   :  { %1729 = vmatprep.subr.mxu0 %v3160_v41  ;;  %2850 = vmatprep.subr.mxu1 %v3165_v42  ;;  %v3774_v41 = vld [vmem:[#allocation25_spill] sm:$0xff] }
  0x8e   :  { %1612 = vmatprep.mubr.f32.mxu0 %v3739_v15  ;;  %1730 = vmatpush1.msra.mxu0 %v3169_v43  ;;  %v2030_v43 = vsel %vm811_vm5, %v2028_v35, %v2029_v36 }
  0x8f   :  { %2851 = vmatpush3.msra.mxu1 %v3165_v42  ;;  %2642 = vmatmul.mubr.msk.f32.gmra.mxu0 %vm162_vm1, %v3227_v62  ;;  %v3775_v42 = vld [vmem:[#allocation26_spill] sm:$0xff] }
  0x90   :  { %1731 = vmatprep.subr.mxu0 %v3173_v44  ;;  %2852 = vmatprep.subr.mxu1 %v3177_v45  ;;  %v3776_v44 = vld [vmem:[#allocation27_spill] sm:$0xff] }
  0x91   :  { %1732 = vmatpush1.msra.mxu0 %v3179_v46  ;;  %2853 = vmatpush3.msra.mxu1 %v3177_v45  ;;  %v3777_v45 = vld [vmem:[#allocation28_spill] sm:$0xff]  ;;  %v2032_v46 = vsel %vm811_vm5, %v2029_v36, %v2031_v38 }
  0x92   :  { %1733 = vmatprep.subr.mxu0 %v3185_v49  ;;  %2854 = vmatprep.subr.mxu1 %v3191_v51  ;;  %v3778_v49 = vld [vmem:[#allocation29_spill] sm:$0xff] }
  0x93   :  { %1734 = vmatpush1.msra.mxu0 %v3193_v52  ;;  %1767 = vmatprep.mubr.f32.mxu0 %v3739_v15  ;;  %v3780_v52 = vld [vmem:[#allocation31_spill] sm:$0xff] }
  0x94   :  { %2855 = vmatpush3.msra.mxu1 %v3191_v51  ;;  %2856 = vmatprep.mubr.msk.f32.mxu1 %vm162_vm1, %v1696_v7  ;;  %v3779_v51 = vld [vmem:[#allocation30_spill] sm:$0xff] }
  0x95   :  { %2645 = vmatmul.mubr.msk.f32.vlgmr.msra.gmra.mxu0 %vm162_vm1, %v1696_v7  ;;  %2857 = vmatmul.mubr.msk.f32.vlgmr.msra.gmra.mxu1 %vm162_vm1, %v1698_v8 }
  0x96   :  { %1894 = vmatprep.subr.mxu0 %v3203_v55  ;;  %2859 = vmatprep.subr.mxu1 %v3207_v56  ;;  %v3781_v55 = vld [vmem:[#allocation32_spill] sm:$0xff] }
  0x97   :  { %1895 = vmatpush1.msra.mxu0 %v3209_v57  ;;  %2860 = vmatpush3.msra.mxu1 %v3207_v56  ;;  %v2195_v56 = vrot.slane %v3422_v13, 5  ;;  %v2196_v57 = vrot.slane %v3227_v62, 5 }
  0x98   :  { %1896 = vmatprep.subr.mxu0 %v3213_v58  ;;  %2861 = vmatprep.subr.mxu1 %v3217_v59  ;;  %v2198_v58 = vrot.slane %v3237_v19, 5  ;;  %v3784_v19 = vld [vmem:[#allocation35_spill] sm:$0xff] }
  0x99   :  { %1773 = vmatprep.mubr.f32.mxu0 %v3739_v15  ;;  %1897 = vmatpush1.msra.mxu0 %v3221_v60  ;;  %v2197_v60 = vsel %vm979_vm6, %v2195_v56, %v2196_v57 }
  0x9a   :  { %2862 = vmatpush3.msra.mxu1 %v3217_v59  ;;  %2646 = vmatmul.mubr.msk.f32.gmra.mxu0 %vm162_vm1, %v1698_v8  ;;  %v3782_v59 = vld [vmem:[#allocation33_spill] sm:$0xff] }
  0x9b   :  { %1898 = vmatprep.subr.mxu0 %v3225_v61  ;;  %2863 = vmatprep.subr.mxu1 %v3231_v63  ;;  %v3783_v61 = vld [vmem:[#allocation34_spill] sm:$0xff] }
  0x9c   :  { %1899 = vmatpush1.msra.mxu0 %v3762_v14  ;;  %2864 = vmatpush3.msra.mxu1 %v3231_v63  ;;  %v2199_v63 = vsel %vm979_vm6, %v2196_v57, %v2198_v58 }
  0x9d   :  { %1900 = vmatprep.subr.mxu0 %v3763_v20  ;;  %2865 = vmatprep.subr.mxu1 %v3764_v23 }
  0x9e   :  { %1901 = vmatpush1.msra.mxu0 %v3765_v24  ;;  %1934 = vmatprep.mubr.f32.mxu0 %v3739_v15 }
  0x9f   :  { %2866 = vmatpush3.msra.mxu1 %v3764_v23  ;;  %2867 = vmatprep.mubr.msk.f32.mxu1 %vm162_vm1, %v1863_v21 }
  0xa0   :  { %2649 = vmatmul.mubr.msk.f32.vlgmr.msra.gmra.mxu0 %vm162_vm1, %v1863_v21  ;;  %2868 = vmatmul.mubr.msk.f32.vlgmr.msra.gmra.mxu1 %vm162_vm1, %v1865_v25 }
  0xa1   :  { %2061 = vmatprep.subr.mxu0 %v3766_v26  ;;  %2870 = vmatprep.subr.mxu1 %v3767_v29 }
  0xa2   :  { %2062 = vmatpush1.msra.mxu0 %v3768_v31  ;;  %2871 = vmatpush3.msra.mxu1 %v3767_v29 }
  0xa3   :  { %2063 = vmatprep.subr.mxu0 %v3769_v32  ;;  %2872 = vmatprep.subr.mxu1 %v3770_v34 }
  0xa4   :  { %1940 = vmatprep.mubr.f32.mxu0 %v3739_v15  ;;  %2064 = vmatpush1.msra.mxu0 %v3771_v37 }
  0xa5   :  { %2873 = vmatpush3.msra.mxu1 %v3770_v34  ;;  %2650 = vmatmul.mubr.msk.f32.gmra.mxu0 %vm162_vm1, %v1865_v25 }
  0xa6   :  { %2065 = vmatprep.subr.mxu0 %v3772_v39  ;;  %2874 = vmatprep.subr.mxu1 %v3773_v40 }
  0xa7   :  { %2066 = vmatpush1.msra.mxu0 %v3774_v41  ;;  %2875 = vmatpush3.msra.mxu1 %v3773_v40  ;;  %v1316_v40 = vlaneseq }
  0xa8   :  { %2067 = vmatprep.subr.mxu0 %v3775_v42  ;;  %2876 = vmatprep.subr.mxu1 %v3776_v44 }
  0xa9   :  { %2068 = vmatpush1.msra.mxu0 %v3777_v45  ;;  %2101 = vmatprep.mubr.f32.mxu0 %v3739_v15 }
  0xaa   :  { %2877 = vmatpush3.msra.mxu1 %v3776_v44  ;;  %2878 = vmatprep.mubr.msk.f32.mxu1 %vm162_vm1, %v2030_v43  ;;  %v3615_v44 = vshrl.u32 %v1316_v40, 7 }
  0xab   :  { %2653 = vmatmul.mubr.msk.f32.vlgmr.msra.gmra.mxu0 %vm162_vm1, %v2030_v43  ;;  %2879 = vmatmul.mubr.msk.f32.vlgmr.msra.gmra.mxu1 %vm162_vm1, %v2032_v46 }
  0xac   :  { %2228 = vmatprep.subr.mxu0 %v3778_v49  ;;  %2881 = vmatprep.subr.mxu1 %v3779_v51  ;;  %v1322_v56 = vsub.s32 1, %v3615_v44 }
  0xad   :  { %2229 = vmatpush1.msra.mxu0 %v3780_v52  ;;  %2882 = vmatpush3.msra.mxu1 %v3779_v51  ;;  %v1318_v52 = vsub.s32 0, %v3615_v44 }
  0xae   :  { %2230 = vmatprep.subr.mxu0 %v3781_v55  ;;  %2883 = vmatprep.subr.mxu1 %v3330_v22  ;;  %v3623_v55 = vld [vmem:[%s3692_s2] sm:$0x7]  ;;  %s3008_s2 = smov [#allocation8]  }
  0xaf   :  { %2107 = vmatprep.mubr.f32.mxu0 %v3739_v15  ;;  %2231 = vmatpush1.msra.mxu0 %v3334_v16  ;;  %v3788_v16 = vrot.slane %v3227_v62, 6  ;;  %s2599_s7 = sshll.u32 %s3008_s2, 4  ;;  %s2600_s7 = int_to_ptr.vmem [resolvable:$true] %s2599_s7 }
  0xb0   :  { %2884 = vmatpush3.msra.mxu1 %v3330_v22  ;;  %2654 = vmatmul.mubr.msk.f32.gmra.mxu0 %vm162_vm1, %v2032_v46  ;;  %v3787_v22 = vld [vmem:[#allocation38_spill] sm:$0xff]  ;;  %s2973_s8 = scalar_lea.vmem %s2600_s7, 96  ;;  %p2978_p2 = scmp.lt.s32.totalorder %s2600_s7, %s2600_s7 }
  0xb1   :  { %2232 = vmatprep.subr.mxu0 %v3338_v27  ;;  %2885 = vmatprep.subr.mxu1 %v3342_v28  ;;  %v3785_v27 = vld [vmem:[#allocation36_spill] sm:$0xff]  ;;  %p2974_p1 = scmp.ne.s32.totalorder %s2600_s7, %s2973_s8  ;;  %p2979_p3 = scmp.lt.s32.totalorder %s2973_s8, %s2973_s8 }
  0xb2   :  { %2233 = vmatpush1.msra.mxu0 %v3782_v59  ;;  %2886 = vmatpush3.msra.mxu1 %v3342_v28 }
  0xb3   :  { %2234 = vmatprep.subr.mxu0 %v3350_v18  ;;  %2887 = vmatprep.subr.mxu1 %v3355_v30  ;;  %v3786_v18 = vld [vmem:[#allocation37_spill] sm:$0xff]  ;;  %p2980_p4 = por %p2979_p3, %p2978_p2 }
  0xb4   :  { %2235 = vmatpush1.msra.mxu0 %v3783_v61  ;;  %2268 = vmatprep.mubr.f32.mxu0 %v3739_v15 }
  0xb5   :  { %2888 = vmatpush3.msra.mxu1 %v3355_v30  ;;  %2889 = vmatprep.mubr.msk.f32.mxu1 %vm162_vm1, %v2197_v60  ;;  %v2362_v30 = vrot.slane %v3422_v13, 6  ;;  %p2981_p5 = pnand %p2980_p4, %p2974_p1 }
  0xb6   :  { %2657 = vmatmul.mubr.msk.f32.vlgmr.msra.gmra.mxu0 %vm162_vm1, %v2197_v60  ;;  %2890 = vmatmul.mubr.msk.f32.vlgmr.msra.gmra.mxu1 %vm162_vm1, %v2199_v63  ;;  %v3627_v60 = vrot.slane %v3623_v55, %v1318_v52 }
  0xb7   :  { %2395 = vmatprep.subr.mxu0 %v3784_v19  ;;  %2892 = vmatprep.subr.mxu1 %v3785_v27  ;;  %v2364_v28 = vsel %vm1147_vm2, %v2362_v30, %v3788_v16  ;;  %v3630_v19 = vrot.slane %v3623_v55, %v1322_v56 }
  0xb8   :  { %2396 = vmatpush1.msra.mxu0 %v3786_v18  ;;  %2893 = vmatpush3.msra.mxu1 %v3785_v27 }
  0xb9   :  { %2397 = vmatprep.subr.mxu0 %v3787_v22  ;;  %2894 = vmatprep.subr.mxu1 %v3381_v0 }
  0xba   :  { %2274 = vmatprep.mubr.f32.mxu0 %v3739_v15  ;;  %2398 = vmatpush1.msra.mxu0 %v3385_v48 }
  0xbb   :  { %2895 = vmatpush3.msra.mxu1 %v3381_v0  ;;  %2658 = vmatmul.mubr.msk.f32.gmra.mxu0 %vm162_vm1, %v2199_v63 }
  0xbc   :  { %2399 = vmatprep.subr.mxu0 %v3389_v53  ;;  %2896 = vmatprep.subr.mxu1 %v3393_v12  ;;  %v3790_v53 = vld [vmem:[#allocation16_spill] sm:$0xff] }
  0xbd   :  { %2400 = vmatpush1.msra.mxu0 %v3395_v17  ;;  %2897 = vmatpush3.msra.mxu1 %v3393_v12 }
  0xbe   :  { %2401 = vmatprep.subr.mxu0 %v3399_v50  ;;  %2898 = vmatprep.subr.mxu1 %v3403_v47 }
  0xbf   :  { %2402 = vmatpush1.msra.mxu0 %v3789_v54  ;;  %2435 = vmatprep.mubr.f32.mxu0 %v3739_v15 }
  0xc0   :  { %2899 = vmatpush3.msra.mxu1 %v3403_v47  ;;  %2900 = vmatprep.mubr.msk.f32.mxu1 %vm162_vm1, %v2364_v28 }
  0xc1   :  { %2661 = vmatmul.mubr.msk.f32.vlgmr.msra.gmra.mxu0 %vm162_vm1, %v2364_v28  ;;  %2901 = vmatmul.mubr.msk.f32.vlgmr.msra.gmra.mxu1 %vm162_vm1, %v3790_v53 }
  0xc2   :  { %2441 = vmatprep.mubr.f32.mxu0 %v3739_v15 }
  0xc5   :  { %2662 = vmatmul.mubr.msk.f32.gmra.mxu0 %vm162_vm1, %v3790_v53 }
  0xf1   :  { %v233_v62 = vpop.f32.mrf.mxu0 }
  0xf3   :  { %v235_v50 = vpop.f32.mrf.mxu0  ;;  %v3617_v46 = vpop.f32.mrf.mxu1 }
  0xf5   :  { %v310_v57 = vpop.f32.mrf.mxu1 }
  0xf7   :  { %v239_v17 = vpop.f32.mrf.mxu0 }
  0xf9   :  { %v241_v0 = vpop.f32.mrf.mxu0 }
  0xfd   :  { %v389_v48 = vpop.f32.mrf.mxu0  ;;  %v2770_v27 = vpop.f32.mrf.mxu1 }
  0xfe   :  { %v390_v12 = vadd.f32 %v389_v48, %v233_v62  ;;  %v3635_v48 = vld [vmem:[#allocation7] sm:$0xff] }
  0xff   :  { %v391_v13 = vpop.f32.mrf.mxu0  ;;  %v466_v54 = vpop.f32.mrf.mxu1 }
 0x100   :  { %v392_v47 = vadd.f32 %v391_v13, %v235_v50 }
 0x102   :  { %v395_v33 = vpop.f32.mrf.mxu0 }
 0x103   :  { %v396_v1 = vadd.f32 %v395_v33, %v239_v17 }
 0x104   :  { %v397_v2 = vpop.f32.mrf.mxu0 }
 0x105   :  { %v398_v3 = vadd.f32 %v397_v2, %v241_v0  ;;  %v3642_v2 = vld [vmem:[#allocation7 + $0x8] sm:$0xff] }
 0x108   :  { %v551_v4 = vpop.f32.mrf.mxu0  ;;  %v2781_v0 = vpop.f32.mrf.mxu1 }
 0x109   :  { %v637_v5 = vadd.f32 %v551_v4, %v390_v12  ;;  %v3637_v12 = vld [vmem:[#allocation7 + $0x18] sm:$0xff] }
 0x10a   :  { %v553_v6 = vpop.f32.mrf.mxu0 }
 0x10b   :  { %v638_v7 = vadd.f32 %v553_v6, %v392_v47 }
 0x10d   :  { %v557_v15 = vpop.f32.mrf.mxu0 }
 0x10e   :  { %v640_v8 = vadd.f32 %v557_v15, %v396_v1  ;;  %v628_v15 = vpop.f32.mrf.mxu1 }
 0x10f   :  { %v559_v9 = vpop.f32.mrf.mxu0 }
 0x110   :  { %v641_v10 = vadd.f32 %v559_v9, %v398_v3  ;;  %v3644_v3 = vld [vmem:[#allocation7 + $0x20] sm:$0xff] }
 0x113   :  { %v719_v11 = vpop.f32.mrf.mxu0 }
 0x114   :  { %v805_v14 = vadd.f32 %v719_v11, %v637_v5  ;;  %v2792_v11 = vpop.f32.mrf.mxu1 }
 0x115   :  { %v721_v20 = vpop.f32.mrf.mxu0 }
 0x116   :  { %v806_v21 = vadd.f32 %v721_v20, %v638_v7 }
 0x118   :  { %v725_v23 = vpop.f32.mrf.mxu0 }
 0x119   :  { %v808_v24 = vadd.f32 %v725_v23, %v640_v8  ;;  %v796_v23 = vpop.f32.mrf.mxu1 }
 0x11a   :  { %v727_v25 = vpop.f32.mrf.mxu0 }
 0x11b   :  { %v809_v26 = vadd.f32 %v727_v25, %v641_v10 }
 0x11e   :  { %v887_v29 = vpop.f32.mrf.mxu0 }
 0x11f   :  { %v973_v31 = vadd.f32 %v887_v29, %v805_v14 }
 0x120   :  { %v889_v32 = vpop.f32.mrf.mxu0 }
 0x121   :  { %v974_v34 = vadd.f32 %v889_v32, %v806_v21 }
 0x123   :  { %v893_v35 = vpop.f32.mrf.mxu0 }
 0x124   :  { %v976_v36 = vadd.f32 %v893_v35, %v808_v24  ;;  %v2803_v24 = vpop.f32.mrf.mxu1 }
 0x125   :  { %v895_v37 = vpop.f32.mrf.mxu0 }
 0x126   :  { %v977_v38 = vadd.f32 %v895_v37, %v809_v26  ;;  %v964_v29 = vpop.f32.mrf.mxu1 }
 0x129   :  { %v1055_v39 = vpop.f32.mrf.mxu0 }
 0x12a   :  { %v1141_v41 = vadd.f32 %v1055_v39, %v973_v31  ;;  %v2814_v31 = vpop.f32.mrf.mxu1 }
 0x12b   :  { %v1057_v42 = vpop.f32.mrf.mxu0 }
 0x12c   :  { %v1142_v43 = vadd.f32 %v1057_v42, %v974_v34  ;;  %v1132_v35 = vpop.f32.mrf.mxu1 }
 0x12e   :  { %v1061_v45 = vpop.f32.mrf.mxu0 }
 0x12f   :  { %v1144_v49 = vadd.f32 %v1061_v45, %v976_v36 }
 0x130   :  { %v1063_v51 = vpop.f32.mrf.mxu0 }
 0x131   :  { %v1145_v30 = vadd.f32 %v1063_v51, %v977_v38 }
 0x134   :  { %v1223_v58 = vpop.f32.mrf.mxu0  ;;  %v2825_v37 = vpop.f32.mrf.mxu1 }
 0x135   :  { %v1309_v59 = vadd.f32 %v1223_v58, %v1141_v41 }
 0x136   :  { %v1225_v61 = vpop.f32.mrf.mxu0  ;;  %v1300_v39 = vpop.f32.mrf.mxu1 }
 0x137   :  { %v1310_v63 = vadd.f32 %v1225_v61, %v1142_v43  ;;  %v1331_v18 = vadd.f32 %v3627_v60, %v1309_v59  ;;  %v467_v59 = vadd.f32 %v466_v54, %v310_v57 }
 0x139   :  { %v1229_v22 = vpop.f32.mrf.mxu0  ;;  %v1332_v16 = vadd.f32 %v3630_v19, %v1310_v63  ;;  %v1337_v62 = vmax.f32 %v1331_v18, 0.0  ;;  %v472_v63 = vadd.f32 %v2770_v27, %v3617_v46  ;;  %v639_v18 = vadd.f32 %v628_v15, %v467_v59 }
 0x13a   :  { %v1312_v28 = vadd.f32 %v1229_v22, %v1144_v49 }
 0x13b   :  { %v1231_v53 = vpop.f32.mrf.mxu0  ;;  %v1338_v13 = vmax.f32 %v1332_v16, 0.0  ;;  %v1343_v4 = vmul.f32 %v1337_v62, %v3635_v48  ;;  %v807_v16 = vadd.f32 %v796_v23, %v639_v18 }
 0x13c   :  { %v1334_v50 = vadd.f32 %v3627_v60, %v1312_v28  ;;  %v1313_v17 = vadd.f32 %v1231_v53, %v1145_v30  ;;  %v642_v30 = vadd.f32 %v2781_v0, %v472_v63 }
 0x13d   :  { %v1344_v8 = vmul.f32 %v1338_v13, %v3642_v2 }
 0x13e   :  { %v1340_v47 = vmax.f32 %v1334_v50, 0.0  ;;  %v1335_v33 = vadd.f32 %v3630_v19, %v1313_v17  ;;  %v3640_v1 = vpop.f32.mrf.mxu0  ;;  %v810_v62 = vadd.f32 %v2792_v11, %v642_v30  ;;  %v975_v50 = vadd.f32 %v964_v29, %v807_v16 }
 0x140   :  { %v1346_v5 = vmul.f32 %v1340_v47, %v3637_v12  ;;  %v1341_v6 = vmax.f32 %v1335_v33, 0.0  ;;  %v1454_v7 = vpop.f32.mrf.mxu0  ;;  %v2836_v41 = vpop.f32.mrf.mxu1  ;;  %v978_v13 = vadd.f32 %v2803_v24, %v810_v62  ;;  %v1143_v47 = vadd.f32 %v1132_v35, %v975_v50 }
 0x141   :  { %v1326_v33 = vsub.s32 2, %v3615_v44 }
 0x142   :  { %v3649_v9 = vmax.f32 %v1343_v4, %v1346_v5  ;;  %v1347_v10 = vmul.f32 %v1341_v6, %v3644_v3  ;;  %v1529_v43 = vpop.f32.mrf.mxu1  ;;  %v1146_v5 = vadd.f32 %v2814_v31, %v978_v13  ;;  %v1311_v6 = vadd.f32 %v1300_v39, %v1143_v47 }
 0x143   :  { %v3661_v46 = vrot.slane %v3623_v55, %v1326_v33 }
 0x144   :  { %v3652_v14 = vmax.f32 %v1344_v8, %v1347_v10  ;;  %v1458_v20 = vpop.f32.mrf.mxu0  ;;  %v1314_v8 = vadd.f32 %v2825_v37, %v1146_v5  ;;  %v3666_v37 = vld [vmem:[#allocation7 + $0x10] sm:$0xff] }
 0x145   :  { %v1333_v15 = vadd.f32 %v3661_v46, %v1311_v6 }
 0x146   :  { %v3654_v21 = vpop.f32.mrf.mxu0  ;;  %v1336_v23 = vadd.f32 %v3661_v46, %v1314_v8 }
 0x147   :  { %v1339_v39 = vmax.f32 %v1333_v15, 0.0 }
 0x148   :  { %v1342_v50 = vmax.f32 %v1336_v23, 0.0 }
 0x14a   :  { %v1608_v25 = vpop.f32.mrf.mxu0  ;;  %v2847_v51 = vpop.f32.mrf.mxu1 }
 0x14b   :  { %v1609_v10 = vadd.f32 %v1608_v25, %v3640_v1  ;;  %v1691_v24 = vadd.f32 %v2847_v51, %v2836_v41  ;;  %v149_v25 = vld [vmem:[#allocation7 + $0x28] sm:$0xff] }
 0x14c   :  { %v1610_v26 = vpop.f32.mrf.mxu0  ;;  %v1685_v56 = vpop.f32.mrf.mxu1  ;;  %v1348_v33 = vmul.f32 %v1342_v50, %v149_v25 }
 0x14d   :  { %v1611_v29 = vadd.f32 %v1610_v26, %v1454_v7  ;;  %v1686_v59 = vadd.f32 %v1685_v56, %v1529_v43  ;;  %v1345_v43 = vmul.f32 %v1339_v39, %v3666_v37 }
 0x14f   :  { %v1614_v32 = vpop.f32.mrf.mxu0 }
 0x150   :  { %v1615_v55 = vadd.f32 %v1614_v32, %v1458_v20 }
 0x151   :  { %v1616_v34 = vpop.f32.mrf.mxu0 }
 0x152   :  { %v1617_v47 = vadd.f32 %v1616_v34, %v3654_v21 }
 0x155   :  { %v1769_v36 = vpop.f32.mrf.mxu0  ;;  %v2858_v61 = vpop.f32.mrf.mxu1 }
 0x156   :  { %v1855_v35 = vadd.f32 %v1769_v36, %v1609_v10  ;;  %v1860_v63 = vadd.f32 %v2858_v61, %v1691_v24 }
 0x157   :  { %v1771_v38 = vpop.f32.mrf.mxu0  ;;  %v1846_v53 = vpop.f32.mrf.mxu1 }
 0x158   :  { %v1856_v18 = vadd.f32 %v1771_v38, %v1611_v29  ;;  %v1857_v13 = vadd.f32 %v1846_v53, %v1686_v59  ;;  %v1357_v59 = vrot.slane %v3652_v14, 4 }
 0x15a   :  { %v1775_v40 = vpop.f32.mrf.mxu0 }
 0x15b   :  { %v1858_v41 = vadd.f32 %v1775_v40, %v1615_v55 }
 0x15c   :  { %v1777_v42 = vpop.f32.mrf.mxu0 }
 0x15d   :  { %v1859_v61 = vadd.f32 %v1777_v42, %v1617_v47 }
 0x160   :  { %v1936_v45 = vpop.f32.mrf.mxu0  ;;  %v2869_v17 = vpop.f32.mrf.mxu1 }
 0x161   :  { %v2022_v30 = vadd.f32 %v1936_v45, %v1855_v35  ;;  %v2027_v1 = vadd.f32 %v2869_v17, %v1860_v63  ;;  %v1350_v35 = vrot.slane %v3649_v9, 4 }
 0x162   :  { %v1938_v49 = vpop.f32.mrf.mxu0  ;;  %v2013_v54 = vpop.f32.mrf.mxu1 }
 0x163   :  { %v2023_v7 = vadd.f32 %v1938_v49, %v1856_v18  ;;  %v2024_v51 = vadd.f32 %v2013_v54, %v1857_v13 }
 0x165   :  { %v1942_v52 = vpop.f32.mrf.mxu0 }
 0x166   :  { %v2025_v20 = vadd.f32 %v1942_v52, %v1858_v41 }
 0x167   :  { %v3656_v58 = vpop.f32.mrf.mxu0 }
 0x168   :  { %v2026_v6 = vadd.f32 %v3656_v58, %v1859_v61 }
 0x16b   :  { %v2103_v22 = vpop.f32.mrf.mxu0  ;;  %v2880_v27 = vpop.f32.mrf.mxu1 }
 0x16c   :  { %v2189_v26 = vadd.f32 %v2103_v22, %v2022_v30  ;;  %v2194_v56 = vadd.f32 %v2880_v27, %v2027_v1  ;;  %v1363_v22 = vmax.f32 %v1345_v43, %v1348_v33  ;;  %v1351_v1 = vmax.f32 %v3649_v9, %v1350_v35 }
 0x16d   :  { %v2105_v28 = vpop.f32.mrf.mxu0  ;;  %v2180_v31 = vpop.f32.mrf.mxu1 }
 0x16e   :  { %v2190_v32 = vadd.f32 %v2105_v28, %v2023_v7  ;;  %v2191_v5 = vadd.f32 %v2180_v31, %v2024_v51 }
 0x170   :  { %v2109_v4 = vpop.f32.mrf.mxu0 }
 0x171   :  { %v2192_v21 = vadd.f32 %v2109_v4, %v2025_v20  ;;  %v1352_v20 = vrot.slane %v1351_v1, 2 }
 0x172   :  { %v2111_v57 = vpop.f32.mrf.mxu0 }
 0x173   :  { %v2193_v27 = vadd.f32 %v2111_v57, %v2026_v6  ;;  %v1353_v33 = vmax.f32 %v1351_v1, %v1352_v20 }
 0x176   :  { %v2270_v0 = vpop.f32.mrf.mxu0  ;;  %v2891_v16 = vpop.f32.mrf.mxu1 }
 0x177   :  { %v2356_v38 = vadd.f32 %v2270_v0, %v2189_v26  ;;  %v2361_v53 = vadd.f32 %v2891_v16, %v2194_v56 }
 0x178   :  { %v2272_v11 = vpop.f32.mrf.mxu0  ;;  %v2347_v45 = vpop.f32.mrf.mxu1 }
 0x179   :  { %v2357_v34 = vadd.f32 %v2272_v11, %v2190_v32  ;;  %v2358_v8 = vadd.f32 %v2347_v45, %v2191_v5  ;;  %v1364_v11 = vrot.slane %v1363_v22, 4 }
 0x17b   :  { %v2276_v62 = vpop.f32.mrf.mxu0  ;;  %v1365_v13 = vmax.f32 %v1363_v22, %v1364_v11 }
 0x17c   :  { %v2359_v42 = vadd.f32 %v2276_v62, %v2192_v21 }
 0x17d   :  { %v2278_v36 = vpop.f32.mrf.mxu0 }
 0x17e   :  { %v2360_v29 = vadd.f32 %v2278_v36, %v2193_v27 }
 0x181   :  { %v2437_v17 = vpop.f32.mrf.mxu0  ;;  %v2902_v49 = vpop.f32.mrf.mxu1 }
 0x182   :  { %v2523_v40 = vadd.f32 %v2437_v17, %v2356_v38  ;;  %v2528_v15 = vadd.f32 %v2902_v49, %v2361_v53  ;;  %v1354_v49 = vrot.slane %v1353_v33, 1 }
 0x183   :  { %v2439_v54 = vpop.f32.mrf.mxu0  ;;  %v2514_v0 = vpop.f32.mrf.mxu1 }
 0x184   :  { %v2529_v52 = vadd.f32 %v2523_v40, %v3627_v60  ;;  %v2524_v28 = vadd.f32 %v2439_v54, %v2357_v34  ;;  %v2534_v10 = vadd.f32 %v2528_v15, %v3661_v46  ;;  %v2525_v23 = vadd.f32 %v2514_v0, %v2358_v8 }
 0x185   :  { %v2443_v24 = vpop.f32.mrf.mxu0 }
 0x186   :  { %v2530_v58 = vadd.f32 %v2524_v28, %v3630_v19  ;;  %v2526_v4 = vadd.f32 %v2443_v24, %v2359_v42  ;;  %v2540_v31 = vmax.f32 %v2534_v10, 0.0  ;;  %v2531_v39 = vadd.f32 %v2525_v23, %v3661_v46 }
 0x187   :  { %v2445_v57 = vpop.f32.mrf.mxu0  ;;  %v2535_v63 = vmax.f32 %v2529_v52, 0.0  ;;  %v1358_v46 = vmax.f32 %v3652_v14, %v1357_v59  ;;  %v1355_v28 = vmax.f32 %v1353_v33, %v1354_v49 }
 0x188   :  { %v2532_v55 = vadd.f32 %v2526_v4, %v3627_v60  ;;  %v2527_v18 = vadd.f32 %v2445_v57, %v2360_v29  ;;  %v2537_v30 = vmax.f32 %v2531_v39, 0.0  ;;  %v2536_v16 = vmax.f32 %v2530_v58, 0.0 }
 0x189   :  { %v2546_v47 = vmul.f32 %v2540_v31, %v149_v25  ;;  %v2541_v7 = vmul.f32 %v2535_v63, %v3635_v48  ;;  %v1359_v9 = vrot.slane %v1358_v46, 2 }
 0x18a   :  { %v2538_v62 = vmax.f32 %v2532_v55, 0.0  ;;  %v2533_v50 = vadd.f32 %v2527_v18, %v3630_v19  ;;  %v2543_v41 = vmul.f32 %v2537_v30, %v3666_v37  ;;  %v2542_v43 = vmul.f32 %v2536_v16, %v3642_v2 }
 0x18b   :  { %v1366_v19 = vrot.slane %v1365_v13, 2  ;;  %v3007_v2 = vmov 1983009808  }
 0x18c   :  { %v2544_v26 = vmul.f32 %v2538_v62, %v3637_v12  ;;  %v2539_v36 = vmax.f32 %v2533_v50, 0.0  ;;  %v2561_v60 = vmax.f32 %v2543_v41, %v2546_v47  ;;  %v1360_v12 = vmax.f32 %v1358_v46, %v1359_v9 }
 0x18d   :  { %v1367_v45 = vmax.f32 %v1365_v13, %v1366_v19  ;;  %v2577_v6 = vunpack.c.l.s4 %v3007_v2 }
 0x18e   :  { %v2547_v51 = vmax.f32 %v2541_v7, %v2544_v26  ;;  %v2545_v56 = vmul.f32 %v2539_v36, %v3644_v3  ;;  %v2562_v61 = vrot.slane %v2561_v60, 4  ;;  %v1361_v22 = vrot.slane %v1360_v12, 1 }
 0x18f   :  { %v1368_v34 = vrot.slane %v1367_v45, 1  ;;  %v2578_v54 = vunpack.c.0.s8 %v2577_v6 }
 0x190   :  { %v2548_v25 = vrot.slane %v2547_v51, 4  ;;  %v2554_v32 = vmax.f32 %v2542_v43, %v2545_v56  ;;  %v2563_v37 = vmax.f32 %v2561_v60, %v2562_v61  ;;  %v1362_v0 = vmax.f32 %v1360_v12, %v1361_v22 }
 0x191   :  { %v1369_v23 = vmax.f32 %v1367_v45, %v1368_v34  ;;  %v2581_v24 = vsub.s32 %v2578_v54, %v3615_v44 }
 0x192   :  { %v2549_v38 = vmax.f32 %v2547_v51, %v2548_v25  ;;  %v2555_v14 = vrot.slane %v2554_v32, 4  ;;  %v2564_v48 = vrot.slane %v2563_v37, 2 }
 0x194   :  { %v2550_v5 = vrot.slane %v2549_v38, 2  ;;  %v2556_v53 = vmax.f32 %v2554_v32, %v2555_v14  ;;  %v2565_v17 = vmax.f32 %v2563_v37, %v2564_v48 }
 0x196   :  { %v2551_v21 = vmax.f32 %v2549_v38, %v2550_v5  ;;  %v2557_v3 = vrot.slane %v2556_v53, 2  ;;  %v2566_v40 = vrot.slane %v2565_v17, 1 }
 0x198   :  { %v2552_v8 = vrot.slane %v2551_v21, 1  ;;  %v2558_v15 = vmax.f32 %v2556_v53, %v2557_v3  ;;  %v2567_v52 = vmax.f32 %v2565_v17, %v2566_v40 }
 0x19a   :  { %v2553_v27 = vmax.f32 %v2551_v21, %v2552_v8  ;;  %v2559_v42 = vrot.slane %v2558_v15, 1  ;;  %v2571_v4 = vsel %vm2568_vm7, %v1369_v23, %v2567_v52 }
 0x19b   :  { %v2589_v31 = vrot.slane %v2571_v4, %v2581_v24 }
 0x19c   :  { %v2560_v10 = vmax.f32 %v2558_v15, %v2559_v42  ;;  %v2569_v29 = vsel %vm2568_vm7, %v1355_v28, %v2553_v27 }
 0x19e   :  { %v2570_v58 = vsel %vm2568_vm7, %v1362_v0, %v2560_v10 }
 0x19f   :  { %v2575_v11 = vcombine.low %v2569_v29, %v2570_v58 }
 0x1a1   :  { %v2582_v35 = vrot.slane %v2575_v11, %v2581_v24 }
 0x1a3   :  { %v2590_v39 = vcombine.low %v2582_v35, %v2589_v31 }
 0x1a5   :  { %2592 = vst [vmem:[#allocation8] sm:$0x3f] %v2590_v39 }
 0x1a6   :  { %2984 = shalt.err (!%p2981_p5)
}
 0x1a7   :  { %2602 = dma.vmem_to_hbm [thread:$0]  %s2600_s7, 96, %s3694_s4, [#allocation4]  }
 0x1a8   :  { %2997 = dma.done.wait [#allocation4], 96  }
 0x1a9   :  { %2998 = vsyncadd [#allocation4], 4294967200 }
 0x1aa   :  { %2606 = vsyncpa [#allocation3], 1 }
 0x1ab   :  { %2607 = vsyncpa [#allocation6], 1 }
 0x1ac   :  { %2608 = vsyncpa [#allocation4], 1 }

</bundles_post_ra>
